<compile_context>
chip_gen: v7x
topology: tpu7x:2x2x1
jax: 0.10.0
libtpu: 0.0.40
codegen_flags: <defaults>
</compile_context>

<pallas_src>
import functools

import jax
import jax.numpy as jnp
from jax.experimental import pallas as pl
from jax.experimental.pallas import tpu as pltpu


def _round_up(x, m):
    return ((x + m - 1) // m) * m


# -----------------------------------------------------------------------------
# Kernel
# -----------------------------------------------------------------------------
def _lstm_mlp_kernel(x_ref,                 # (Sc, Bt, D)  time-major input chunk
                     wih0_ref,              # (D, 4H)   bf16 layer-0 input weight
                     b0_ref,                # (1, 4H)   f32  b_ih0 + b_hh0
                     wrec_ref,              # (2H, 8H)  bf16 block-diag [Whh0|Whh1]
                     wih1_ref,              # (H, 4H)   bf16 layer-1 input weight
                     b1_ref,                # (1, 4H)   f32  b_ih1 + b_hh1
                     wd1_ref, bd1_ref,      # (H, DENSE) bf16, (1, DENSE) f32
                     wout_ref, bout_ref,    # (DENSE, OUT_PAD) bf16, (1, OUT_PAD) f32
                     out_ref,               # (Bt, OUT_PAD) f32
                     xproj_ref,             # (Sc, Bt, 4H) f32 scratch (X @ Wih0 + b0)
                     h01_ref,               # (Bt, 2H) f32 scratch  [h0 | h1]
                     c0_ref, c1_ref):       # (Bt, H)  f32 scratch  cell states
    Sc, Bt, D = x_ref.shape
    H = wih1_ref.shape[0]
    bf16 = jnp.bfloat16

    tc = pl.program_id(1)
    last_tc = pl.num_programs(1) - 1

    # ---- first time chunk of this batch tile: zero the carried state -------
    @pl.when(tc == 0)
    def _():
        h01_ref[...] = jnp.zeros_like(h01_ref)
        c0_ref[...] = jnp.zeros_like(c0_ref)
        c1_ref[...] = jnp.zeros_like(c1_ref)

    # ---- hoisted layer-0 input projection for the whole chunk --------------
    # One large-M MXU matmul (Sc*Bt rows) off the serial critical path; b0 is
    # folded in here so no bias add remains inside the recurrence for layer 0.
    x_flat = x_ref[...].reshape(Sc * Bt, D).astype(bf16)
    xp = jnp.dot(x_flat, wih0_ref[...], preferred_element_type=jnp.float32)
    xproj_ref[...] = xp.reshape(Sc, Bt, 4 * H) + b0_ref[...]

    # Layer-1 bias broadcast hoisted out of the unrolled recurrence.
    b1b = jnp.broadcast_to(b1_ref[...], (Bt, 4 * H))

    def gate_math(gates, c):
        # gate columns are pre-permuted to [i, f, o | g]
        sig = 0.5 * jnp.tanh(0.5 * gates[:, :3 * H]) + 0.5   # i, f, o in one pass
        i = sig[:, 0 * H:1 * H]
        f = sig[:, 1 * H:2 * H]
        o = sig[:, 2 * H:3 * H]
        g = jnp.tanh(gates[:, 3 * H:])
        c_new = f * c + i * g
        h_new = o * jnp.tanh(c_new)
        return h_new, c_new

    # ---- recurrence over this chunk (static unroll; the outer trip count is
    # the time-chunk grid axis, so Sc stays small and live ranges bounded) ---
    for t in range(Sc):
        h01 = h01_ref[...]                                    # (Bt, 2H) [h0|h1]
        # Single fused recurrent dot: [:, :4H] = h0 @ Whh0 ; [:, 4H:] = h1 @ Whh1
        rec = jnp.dot(h01.astype(bf16), wrec_ref[...],
                      preferred_element_type=jnp.float32)     # (Bt, 8H)
        gates0 = xproj_ref[t] + rec[:, :4 * H]
        h0n, c0n = gate_math(gates0, c0_ref[...])
        # TODO(synk): inter-layer dropout is identity in eval mode (no RNG here).
        gates1 = rec[:, 4 * H:] + b1b + jnp.dot(
            h0n.astype(bf16), wih1_ref[...], preferred_element_type=jnp.float32)
        h1n, c1n = gate_math(gates1, c1_ref[...])
        c0_ref[...] = c0n
        c1_ref[...] = c1n
        h01_ref[:, :H] = h0n          # write straight into lane ranges: no
        h01_ref[:, H:] = h1n          # per-step concatenate on the serial path

    # ---- dense head on the final hidden state (last time chunk only) -------
    @pl.when(tc == last_tc)
    def _():
        h1_last = h01_ref[:, H:]
        d = jnp.dot(h1_last.astype(bf16), wd1_ref[...],
                    preferred_element_type=jnp.float32) + bd1_ref[...]
        d = jnp.maximum(d, 0.0)       # dropout (identity in eval) then ReLU
        y = jnp.dot(d.astype(bf16), wout_ref[...],
                    preferred_element_type=jnp.float32) + bout_ref[...]
        out_ref[...] = jnp.maximum(y, 0.0)


# -----------------------------------------------------------------------------
# Tiling heuristics
# -----------------------------------------------------------------------------
def _pick_batch_tile(batch):
    """Fill the MXU M dim for big batches, keep >=2 grid tiles for megacore."""
    b8 = _round_up(max(batch, 1), 8)
    if b8 <= 8:
        return 8
    if b8 >= 512:
        return 256                      # MXU-width tiles, still >=2 tiles
    return _round_up(b8 // 2, 8)        # at least 2 tiles (v7x second core)


def _pick_time_chunk(seq_len, cap=16):
    """Largest divisor of S not exceeding `cap` (bounded per-chunk unroll)."""
    best = 1
    for c in range(1, min(seq_len, cap) + 1):
        if seq_len % c == 0:
            best = c
    return best


# -----------------------------------------------------------------------------
# Wrapper
# -----------------------------------------------------------------------------
def lstm_model_forward(x, kparams, *, out_dim, batch_tile=None, time_chunk=None,
                       time_major=False):
    """x: (B, S, D) float32 (PyTorch batch_first), or (S, B, D) if time_major."""
    if time_major:
        x_sbd = x
        S, B, D = x.shape
    else:
        B, S, D = x.shape
        # TODO(synk): feed time-major activations upstream to avoid this extra
        # HBM read+write of x on long sequences (matters most on v5e).
        x_sbd = jnp.transpose(x, (1, 0, 2))

    H = kparams["w_ih1"].shape[0]
    dense_units = kparams["w_d1"].shape[1]
    out_pad = kparams["w_out"].shape[1]

    if batch_tile is None:
        batch_tile = _pick_batch_tile(B)
    B_pad = _round_up(B, batch_tile)
    if B_pad != B:
        x_sbd = jnp.pad(x_sbd, ((0, 0), (0, B_pad - B), (0, 0)))
    n_tiles = B_pad // batch_tile

    if time_chunk is None:
        time_chunk = _pick_time_chunk(S)
    assert S % time_chunk == 0, (S, time_chunk)
    n_chunks = S // time_chunk

    weights = (kparams["w_ih0"], kparams["b0"], kparams["w_rec"],
               kparams["w_ih1"], kparams["b1"],
               kparams["w_d1"], kparams["b_d1"],
               kparams["w_out"], kparams["b_out"])

    # x: (time_chunk, batch_tile, D) block, indexed by (time chunk, batch tile).
    in_specs = [pl.BlockSpec((time_chunk, batch_tile, D), lambda b, t: (t, b, 0))]
    # Weights: constant index map -> fetched once, stay VMEM-resident.
    # TODO(synk): single-buffer (pl.Buffered(1)) these specs once H/dense grow
    # large enough for the doubled weight footprint to matter on v7x VMEM.
    in_specs += [pl.BlockSpec(w.shape, lambda b, t: (0, 0)) for w in weights]
    # Output block revisited across the time axis; written at the last chunk.
    out_spec = pl.BlockSpec((batch_tile, out_pad), lambda b, t: (b, 0))

    scratch_shapes = [
        pltpu.VMEM((time_chunk, batch_tile, 4 * H), jnp.float32),  # X_proj
        pltpu.VMEM((batch_tile, 2 * H), jnp.float32),              # [h0 | h1]
        pltpu.VMEM((batch_tile, H), jnp.float32),                  # c0
        pltpu.VMEM((batch_tile, H), jnp.float32),                  # c1
    ]

    # FLOPs without the zero blocks of W_rec or the padded output lanes.
    flops = (2 * S * B_pad * (D * 4 * H + 3 * H * 4 * H)
             + 2 * B_pad * (H * dense_units + dense_units * out_dim))
    transcendentals = S * B_pad * 2 * 5 * H
    bytes_accessed = (x_sbd.size * x_sbd.dtype.itemsize
                      + sum(int(w.size) * w.dtype.itemsize for w in weights)
                      + B_pad * out_pad * 4)

    y_pad = pl.pallas_call(
        _lstm_mlp_kernel,
        out_shape=jax.ShapeDtypeStruct((B_pad, out_pad), jnp.float32),
        grid=(n_tiles, n_chunks),
        in_specs=in_specs,
        out_specs=out_spec,
        scratch_shapes=scratch_shapes,
        compiler_params=pltpu.CompilerParams(
            dimension_semantics=("parallel", "arbitrary")),
        cost_estimate=pl.CostEstimate(
            flops=flops, transcendentals=transcendentals,
            bytes_accessed=bytes_accessed),
    )(x_sbd, *weights)
    return y_pad[:B, :out_dim]


# -----------------------------------------------------------------------------
# Parameter construction (PyTorch-native layout) and kernel-layout prep
# -----------------------------------------------------------------------------
def make_params(key, input_dim, lstm_hidden, dense_units, output_dim):
    """Deterministic synthetic params in PyTorch-native layout / init ranges."""
    H = lstm_hidden
    ks = jax.random.split(key, 12)

    def u(k, shape, bound):
        return jax.random.uniform(k, shape, jnp.float32, -bound, bound)

    kl = 1.0 / float(H) ** 0.5
    ko = 1.0 / float(dense_units) ** 0.5
    return dict(
        w_ih0=u(ks[0], (4 * H, input_dim), kl),
        w_hh0=u(ks[1], (4 * H, H), kl),
        b_ih0=u(ks[2], (4 * H,), kl),
        b_hh0=u(ks[3], (4 * H,), kl),
        w_ih1=u(ks[4], (4 * H, H), kl),
        w_hh1=u(ks[5], (4 * H, H), kl),
        b_ih1=u(ks[6], (4 * H,), kl),
        b_hh1=u(ks[7], (4 * H,), kl),
        w_d1=u(ks[8], (dense_units, H), kl),
        b_d1=u(ks[9], (dense_units,), kl),
        w_out=u(ks[10], (output_dim, dense_units), ko),
        b_out=u(ks[11], (output_dim,), ko),
    )


def prepare_kernel_params(params, *, mxu_dtype=jnp.bfloat16):
    """PyTorch layout -> kernel layout.

    - transpose weights so the kernel computes x @ W
    - permute gate columns [i,f,g,o] -> [i,f,o,g]
    - fold b_ih + b_hh per layer
    - build block-diagonal W_rec (2H, 8H): [[Whh0, 0], [0, Whh1]]
    - pad the output head to a multiple of 128 lanes (lane-dense store)
    - MXU weights in bf16, biases in f32
    """
    H = params["w_hh0"].shape[1]

    def reorder(w4h):   # (..., 4H) cols [i,f,g,o] -> [i,f,o,g]
        return jnp.concatenate(
            [w4h[..., :2 * H], w4h[..., 3 * H:], w4h[..., 2 * H:3 * H]], axis=-1)

    wih0 = reorder(params["w_ih0"].T)                              # (D, 4H)
    whh0 = reorder(params["w_hh0"].T)                              # (H, 4H)
    b0 = reorder((params["b_ih0"] + params["b_hh0"])[None, :])     # (1, 4H)
    wih1 = reorder(params["w_ih1"].T)                              # (H, 4H)
    whh1 = reorder(params["w_hh1"].T)                              # (H, 4H)
    b1 = reorder((params["b_ih1"] + params["b_hh1"])[None, :])     # (1, 4H)

    z = jnp.zeros((H, 4 * H), jnp.float32)
    w_rec = jnp.concatenate(
        [jnp.concatenate([whh0, z], axis=1),
         jnp.concatenate([z, whh1], axis=1)], axis=0)              # (2H, 8H)

    out_dim, dense_units = params["w_out"].shape
    out_pad = max(128, _round_up(out_dim, 128))
    w_out_pad = jnp.zeros((dense_units, out_pad), jnp.float32)
    w_out_pad = w_out_pad.at[:, :out_dim].set(params["w_out"].T)
    b_out_pad = jnp.zeros((1, out_pad), jnp.float32)
    b_out_pad = b_out_pad.at[:, :out_dim].set(params["b_out"][None, :])

    return dict(
        w_ih0=wih0.astype(mxu_dtype),
        b0=b0.astype(jnp.float32),
        w_rec=w_rec.astype(mxu_dtype),
        w_ih1=wih1.astype(mxu_dtype),
        b1=b1.astype(jnp.float32),
        w_d1=params["w_d1"].T.astype(mxu_dtype),
        b_d1=params["b_d1"][None, :].astype(jnp.float32),
        w_out=w_out_pad.astype(mxu_dtype),
        b_out=b_out_pad.astype(jnp.float32),
    )


# -----------------------------------------------------------------------------
# Pure-JAX references (PyTorch semantics, eval mode)
# -----------------------------------------------------------------------------
def _reference(x_bsd, params, bf16_mxu):
    H = params["w_hh0"].shape[1]
    B, S, _ = x_bsd.shape

    if bf16_mxu:
        def mm(a, b):
            return jnp.dot(a.astype(jnp.bfloat16), b.astype(jnp.bfloat16),
                           preferred_element_type=jnp.float32)
    else:
        def mm(a, b):
            return jnp.dot(a, b, preferred_element_type=jnp.float32)

    def cell(x_t, h, c, wih, whh, bih, bhh):
        g = mm(x_t, wih.T) + mm(h, whh.T) + bih + bhh
        i = jax.nn.sigmoid(g[:, :H])
        f = jax.nn.sigmoid(g[:, H:2 * H])
        gg = jnp.tanh(g[:, 2 * H:3 * H])
        o = jax.nn.sigmoid(g[:, 3 * H:])
        c = f * c + i * gg
        return o * jnp.tanh(c), c

    h0 = c0 = h1 = c1 = jnp.zeros((B, H), jnp.float32)
    for t in range(S):
        x_t = x_bsd[:, t, :]
        h0, c0 = cell(x_t, h0, c0, params["w_ih0"], params["w_hh0"],
                      params["b_ih0"], params["b_hh0"])
        h1, c1 = cell(h0, h1, c1, params["w_ih1"], params["w_hh1"],
                      params["b_ih1"], params["b_hh1"])
    d = jnp.maximum(mm(h1, params["w_d1"].T) + params["b_d1"], 0.0)
    return jnp.maximum(mm(d, params["w_out"].T) + params["b_out"], 0.0)


def reference_forward(x_bsd, params):
    return _reference(x_bsd, params, bf16_mxu=False)


def reference_forward_bf16(x_bsd, params):
    return _reference(x_bsd, params, bf16_mxu=True)


# -----------------------------------------------------------------------------
if __name__ == "__main__":
    # Small shapes consistent with the module's forward.
    B, S, D = 2, 8, 16          # batch, seq_len, input_dim
    H = 32                      # lstm_hidden
    DENSE = 256                 # dense_units (module default)
    OUT = 8                     # output_dim

    key = jax.random.PRNGKey(0)
    kx, kp = jax.random.split(key)
    x = jax.random.normal(kx, (B, S, D), jnp.float32)
    params = make_params(kp, D, H, DENSE, OUT)
    kparams = prepare_kernel_params(params)

    fwd = jax.jit(functools.partial(lstm_model_forward, out_dim=OUT))
    y = jax.block_until_ready(fwd(x, kparams))
    assert y.shape == (B, OUT), y.shape

    # Tight check vs a reference that applies the same bf16 MXU-operand casts.
    y_bf = reference_forward_bf16(x, params)
    assert jnp.allclose(y, y_bf, rtol=1e-2, atol=1e-2), (
        f"max abs err vs bf16 ref {jnp.max(jnp.abs(y - y_bf))}")
    # Loose semantic check vs the full-f32 PyTorch-exact reference.
    y_f32 = reference_forward(x, params)
    assert jnp.allclose(y, y_f32, rtol=7e-2, atol=7e-2), (
        f"max abs err vs f32 ref {jnp.max(jnp.abs(y - y_f32))}")

    print("KERNEL_OK")
</pallas_src>

<mosaic_0001>
module attributes {stable_mosaic.version = 11 : i64} {
  func.func @_lstm_mlp_kernel(%arg0: i32, %arg1: i32, %arg2: memref<8x8x16xf32, #tpu.memory_space<vmem>>, %arg3: memref<16x128xbf16, #tpu.memory_space<vmem>>, %arg4: memref<1x128xf32, #tpu.memory_space<vmem>>, %arg5: memref<64x256xbf16, #tpu.memory_space<vmem>>, %arg6: memref<32x128xbf16, #tpu.memory_space<vmem>>, %arg7: memref<1x128xf32, #tpu.memory_space<vmem>>, %arg8: memref<32x256xbf16, #tpu.memory_space<vmem>>, %arg9: memref<1x256xf32, #tpu.memory_space<vmem>>, %arg10: memref<256x128xbf16, #tpu.memory_space<vmem>>, %arg11: memref<1x128xf32, #tpu.memory_space<vmem>>, %arg12: memref<8x128xf32, #tpu.memory_space<vmem>>, %arg13: memref<8x8x128xf32, #tpu.memory_space<vmem>>, %arg14: memref<8x64xf32, #tpu.memory_space<vmem>>, %arg15: memref<8x32xf32, #tpu.memory_space<vmem>>, %arg16: memref<8x32xf32, #tpu.memory_space<vmem>>) attributes {dimension_semantics = [#tpu.dimension_semantics<parallel>, #tpu.dimension_semantics<arbitrary>], iteration_bounds = array<i64: 1, 1>, scalar_prefetch = 0 : i64, scratch_operands = 4 : i64, tpu.core_type = #tpu.core_type<tc>, window_params = [{transform_indices = @transform_0, window_bounds = array<i64: 8, 8, 16>}, {pipeline_mode = #tpu.pipeline_mode<synchronous>, transform_indices = @transform_1, window_bounds = array<i64: 16, 128>}, {pipeline_mode = #tpu.pipeline_mode<synchronous>, transform_indices = @transform_2, window_bounds = array<i64: 1, 128>}, {pipeline_mode = #tpu.pipeline_mode<synchronous>, transform_indices = @transform_3, window_bounds = array<i64: 64, 256>}, {pipeline_mode = #tpu.pipeline_mode<synchronous>, transform_indices = @transform_4, window_bounds = array<i64: 32, 128>}, {pipeline_mode = #tpu.pipeline_mode<synchronous>, transform_indices = @transform_5, window_bounds = array<i64: 1, 128>}, {pipeline_mode = #tpu.pipeline_mode<synchronous>, transform_indices = @transform_6, window_bounds = array<i64: 32, 256>}, {pipeline_mode = #tpu.pipeline_mode<synchronous>, transform_indices = @transform_7, window_bounds = array<i64: 1, 256>}, {pipeline_mode = #tpu.pipeline_mode<synchronous>, transform_indices = @transform_8, window_bounds = array<i64: 256, 128>}, {pipeline_mode = #tpu.pipeline_mode<synchronous>, transform_indices = @transform_9, window_bounds = array<i64: 1, 128>}, {transform_indices = @transform_10, window_bounds = array<i64: 8, 128>}]} {
    %c0_i32 = arith.constant 0 : i32
    %0 = arith.cmpi eq, %arg1, %c0_i32 : i32
    %1 = arith.extui %0 : i1 to i32
    %c0_i32_0 = arith.constant 0 : i32
    %2 = arith.cmpi ne, %1, %c0_i32_0 : i32
    scf.if %2 {
      %cst_238 = arith.constant 0.000000e+00 : f32
      %468 = vector.broadcast %cst_238 : f32 to vector<8x64xf32>
      %c0_239 = arith.constant 0 : index
      %c0_240 = arith.constant 0 : index
      %469 = vector.load %arg14[%c0_239, %c0_240] : memref<8x64xf32, #tpu.memory_space<vmem>>, vector<8x64xf32>
      tpu.vector_store %arg14[%c0_239, %c0_240], %468 {strides = array<i32>} : memref<8x64xf32, #tpu.memory_space<vmem>>, vector<8x64xf32>,
      %cst_241 = arith.constant 0.000000e+00 : f32
      %470 = vector.broadcast %cst_241 : f32 to vector<8x32xf32>
      %c0_242 = arith.constant 0 : index
      %c0_243 = arith.constant 0 : index
      %471 = vector.load %arg15[%c0_242, %c0_243] : memref<8x32xf32, #tpu.memory_space<vmem>>, vector<8x32xf32>
      tpu.vector_store %arg15[%c0_242, %c0_243], %470 {strides = array<i32>} : memref<8x32xf32, #tpu.memory_space<vmem>>, vector<8x32xf32>,
      %cst_244 = arith.constant 0.000000e+00 : f32
      %472 = vector.broadcast %cst_244 : f32 to vector<8x32xf32>
      %c0_245 = arith.constant 0 : index
      %c0_246 = arith.constant 0 : index
      %473 = vector.load %arg16[%c0_245, %c0_246] : memref<8x32xf32, #tpu.memory_space<vmem>>, vector<8x32xf32>
      tpu.vector_store %arg16[%c0_245, %c0_246], %472 {strides = array<i32>} : memref<8x32xf32, #tpu.memory_space<vmem>>, vector<8x32xf32>,
    } else {
    }
    %c0 = arith.constant 0 : index
    %c0_1 = arith.constant 0 : index
    %c0_2 = arith.constant 0 : index
    %3 = vector.load %arg2[%c0, %c0_1, %c0_2] : memref<8x8x16xf32, #tpu.memory_space<vmem>>, vector<8x8x16xf32>
    %4 = vector.shape_cast %3 : vector<8x8x16xf32> to vector<64x16xf32>
    %5 = arith.truncf %4 : vector<64x16xf32> to vector<64x16xbf16>
    %c0_3 = arith.constant 0 : index
    %c0_4 = arith.constant 0 : index
    %6 = vector.load %arg3[%c0_3, %c0_4] : memref<16x128xbf16, #tpu.memory_space<vmem>>, vector<16x128xbf16>
    %cst = arith.constant dense<0.000000e+00> : vector<64x128xf32>
    %7 = tpu.matmul %5, %6, %cst {dimension_numbers = #tpu.dot_dimension_numbers<[1], [0], [0], [1], [0, 0, 1, 1], [], []>} : vector<64x16xbf16>, vector<16x128xbf16>, vector<64x128xf32> -> vector<64x128xf32>
    %8 = vector.shape_cast %7 : vector<64x128xf32> to vector<8x8x128xf32>
    %c0_5 = arith.constant 0 : index
    %c0_6 = arith.constant 0 : index
    %9 = vector.load %arg4[%c0_5, %c0_6] : memref<1x128xf32, #tpu.memory_space<vmem>>, vector<1x128xf32>
    %10 = vector.shape_cast %9 : vector<1x128xf32> to vector<1x1x128xf32>
    %11 = vector.broadcast %10 : vector<1x1x128xf32> to vector<8x8x128xf32>
    %12 = arith.addf %8, %11 : vector<8x8x128xf32>
    %c0_7 = arith.constant 0 : index
    %c0_8 = arith.constant 0 : index
    %c0_9 = arith.constant 0 : index
    %13 = vector.load %arg13[%c0_7, %c0_8, %c0_9] : memref<8x8x128xf32, #tpu.memory_space<vmem>>, vector<8x8x128xf32>
    tpu.vector_store %arg13[%c0_7, %c0_8, %c0_9], %12 {strides = array<i32>} : memref<8x8x128xf32, #tpu.memory_space<vmem>>, vector<8x8x128xf32>,
    %c0_10 = arith.constant 0 : index
    %c0_11 = arith.constant 0 : index
    %14 = vector.load %arg7[%c0_10, %c0_11] : memref<1x128xf32, #tpu.memory_space<vmem>>, vector<1x128xf32>
    %15 = vector.shape_cast %14 : vector<1x128xf32> to vector<1x128xf32>
    %16 = vector.broadcast %15 : vector<1x128xf32> to vector<8x128xf32>
    %c0_12 = arith.constant 0 : index
    %c0_13 = arith.constant 0 : index
    %17 = vector.load %arg14[%c0_12, %c0_13] : memref<8x64xf32, #tpu.memory_space<vmem>>, vector<8x64xf32>
    %18 = arith.truncf %17 : vector<8x64xf32> to vector<8x64xbf16>
    %c0_14 = arith.constant 0 : index
    %c0_15 = arith.constant 0 : index
    %19 = vector.load %arg5[%c0_14, %c0_15] : memref<64x256xbf16, #tpu.memory_space<vmem>>, vector<64x256xbf16>
    %cst_16 = arith.constant dense<0.000000e+00> : vector<8x256xf32>
    %20 = tpu.matmul %18, %19, %cst_16 {dimension_numbers = #tpu.dot_dimension_numbers<[1], [0], [0], [1], [0, 0, 1, 1], [], []>} : vector<8x64xbf16>, vector<64x256xbf16>, vector<8x256xf32> -> vector<8x256xf32>
    %c0_17 = arith.constant 0 : index
    %c0_18 = arith.constant 0 : index
    %c0_19 = arith.constant 0 : index
    %21 = vector.load %arg13[%c0_17, %c0_18, %c0_19] : memref<8x8x128xf32, #tpu.memory_space<vmem>>, vector<1x8x128xf32>
    %22 = vector.shape_cast %21 : vector<1x8x128xf32> to vector<8x128xf32>
    %23 = vector.extract_strided_slice %20 {offsets = [0, 0], sizes = [8, 128], strides = [1, 1]} : vector<8x256xf32> to vector<8x128xf32>
    %24 = arith.addf %22, %23 : vector<8x128xf32>
    %c0_20 = arith.constant 0 : index
    %c0_21 = arith.constant 0 : index
    %25 = vector.load %arg15[%c0_20, %c0_21] : memref<8x32xf32, #tpu.memory_space<vmem>>, vector<8x32xf32>
    %26 = vector.extract_strided_slice %24 {offsets = [0, 0], sizes = [8, 96], strides = [1, 1]} : vector<8x128xf32> to vector<8x96xf32>
    %cst_22 = arith.constant 5.000000e-01 : f32
    %27 = vector.broadcast %cst_22 : f32 to vector<8x96xf32>
    %28 = arith.mulf %27, %26 : vector<8x96xf32>
    %29 = math.tanh %28 : vector<8x96xf32>
    %cst_23 = arith.constant 5.000000e-01 : f32
    %30 = vector.broadcast %cst_23 : f32 to vector<8x96xf32>
    %31 = arith.mulf %30, %29 : vector<8x96xf32>
    %cst_24 = arith.constant 5.000000e-01 : f32
    %32 = vector.broadcast %cst_24 : f32 to vector<8x96xf32>
    %33 = arith.addf %31, %32 : vector<8x96xf32>
    %34 = vector.extract_strided_slice %33 {offsets = [0, 0], sizes = [8, 32], strides = [1, 1]} : vector<8x96xf32> to vector<8x32xf32>
    %35 = vector.extract_strided_slice %33 {offsets = [0, 32], sizes = [8, 32], strides = [1, 1]} : vector<8x96xf32> to vector<8x32xf32>
    %36 = vector.extract_strided_slice %33 {offsets = [0, 64], sizes = [8, 32], strides = [1, 1]} : vector<8x96xf32> to vector<8x32xf32>
    %37 = vector.extract_strided_slice %24 {offsets = [0, 96], sizes = [8, 32], strides = [1, 1]} : vector<8x128xf32> to vector<8x32xf32>
    %38 = math.tanh %37 : vector<8x32xf32>
    %39 = arith.mulf %35, %25 : vector<8x32xf32>
    %40 = arith.mulf %34, %38 : vector<8x32xf32>
    %41 = arith.addf %39, %40 : vector<8x32xf32>
    %42 = math.tanh %41 : vector<8x32xf32>
    %43 = arith.mulf %36, %42 : vector<8x32xf32>
    %44 = vector.extract_strided_slice %20 {offsets = [0, 128], sizes = [8, 128], strides = [1, 1]} : vector<8x256xf32> to vector<8x128xf32>
    %45 = arith.addf %44, %16 : vector<8x128xf32>
    %46 = arith.truncf %43 : vector<8x32xf32> to vector<8x32xbf16>
    %c0_25 = arith.constant 0 : index
    %c0_26 = arith.constant 0 : index
    %47 = vector.load %arg6[%c0_25, %c0_26] : memref<32x128xbf16, #tpu.memory_space<vmem>>, vector<32x128xbf16>
    %cst_27 = arith.constant dense<0.000000e+00> : vector<8x128xf32>
    %48 = tpu.matmul %46, %47, %cst_27 {dimension_numbers = #tpu.dot_dimension_numbers<[1], [0], [0], [1], [0, 0, 1, 1], [], []>} : vector<8x32xbf16>, vector<32x128xbf16>, vector<8x128xf32> -> vector<8x128xf32>
    %49 = arith.addf %45, %48 : vector<8x128xf32>
    %c0_28 = arith.constant 0 : index
    %c0_29 = arith.constant 0 : index
    %50 = vector.load %arg16[%c0_28, %c0_29] : memref<8x32xf32, #tpu.memory_space<vmem>>, vector<8x32xf32>
    %51 = vector.extract_strided_slice %49 {offsets = [0, 0], sizes = [8, 96], strides = [1, 1]} : vector<8x128xf32> to vector<8x96xf32>
    %cst_30 = arith.constant 5.000000e-01 : f32
    %52 = vector.broadcast %cst_30 : f32 to vector<8x96xf32>
    %53 = arith.mulf %52, %51 : vector<8x96xf32>
    %54 = math.tanh %53 : vector<8x96xf32>
    %cst_31 = arith.constant 5.000000e-01 : f32
    %55 = vector.broadcast %cst_31 : f32 to vector<8x96xf32>
    %56 = arith.mulf %55, %54 : vector<8x96xf32>
    %cst_32 = arith.constant 5.000000e-01 : f32
    %57 = vector.broadcast %cst_32 : f32 to vector<8x96xf32>
    %58 = arith.addf %56, %57 : vector<8x96xf32>
    %59 = vector.extract_strided_slice %58 {offsets = [0, 0], sizes = [8, 32], strides = [1, 1]} : vector<8x96xf32> to vector<8x32xf32>
    %60 = vector.extract_strided_slice %58 {offsets = [0, 32], sizes = [8, 32], strides = [1, 1]} : vector<8x96xf32> to vector<8x32xf32>
    %61 = vector.extract_strided_slice %58 {offsets = [0, 64], sizes = [8, 32], strides = [1, 1]} : vector<8x96xf32> to vector<8x32xf32>
    %62 = vector.extract_strided_slice %49 {offsets = [0, 96], sizes = [8, 32], strides = [1, 1]} : vector<8x128xf32> to vector<8x32xf32>
    %63 = math.tanh %62 : vector<8x32xf32>
    %64 = arith.mulf %60, %50 : vector<8x32xf32>
    %65 = arith.mulf %59, %63 : vector<8x32xf32>
    %66 = arith.addf %64, %65 : vector<8x32xf32>
    %67 = math.tanh %66 : vector<8x32xf32>
    %68 = arith.mulf %61, %67 : vector<8x32xf32>
    %c0_33 = arith.constant 0 : index
    %c0_34 = arith.constant 0 : index
    %69 = vector.load %arg15[%c0_33, %c0_34] : memref<8x32xf32, #tpu.memory_space<vmem>>, vector<8x32xf32>
    tpu.vector_store %arg15[%c0_33, %c0_34], %41 {strides = array<i32>} : memref<8x32xf32, #tpu.memory_space<vmem>>, vector<8x32xf32>,
    %c0_35 = arith.constant 0 : index
    %c0_36 = arith.constant 0 : index
    %70 = vector.load %arg16[%c0_35, %c0_36] : memref<8x32xf32, #tpu.memory_space<vmem>>, vector<8x32xf32>
    tpu.vector_store %arg16[%c0_35, %c0_36], %66 {strides = array<i32>} : memref<8x32xf32, #tpu.memory_space<vmem>>, vector<8x32xf32>,
    %c0_37 = arith.constant 0 : index
    %c0_38 = arith.constant 0 : index
    %71 = vector.load %arg14[%c0_37, %c0_38] : memref<8x64xf32, #tpu.memory_space<vmem>>, vector<8x32xf32>
    tpu.vector_store %arg14[%c0_37, %c0_38], %43 {strides = array<i32>} : memref<8x64xf32, #tpu.memory_space<vmem>>, vector<8x32xf32>,
    %c0_39 = arith.constant 0 : index
    %c32 = arith.constant 32 : index
    %72 = vector.load %arg14[%c0_39, %c32] : memref<8x64xf32, #tpu.memory_space<vmem>>, vector<8x32xf32>
    tpu.vector_store %arg14[%c0_39, %c32], %68 {strides = array<i32>} : memref<8x64xf32, #tpu.memory_space<vmem>>, vector<8x32xf32>,
    %c0_40 = arith.constant 0 : index
    %c0_41 = arith.constant 0 : index
    %73 = vector.load %arg14[%c0_40, %c0_41] : memref<8x64xf32, #tpu.memory_space<vmem>>, vector<8x64xf32>
    %74 = arith.truncf %73 : vector<8x64xf32> to vector<8x64xbf16>
    %c0_42 = arith.constant 0 : index
    %c0_43 = arith.constant 0 : index
    %75 = vector.load %arg5[%c0_42, %c0_43] : memref<64x256xbf16, #tpu.memory_space<vmem>>, vector<64x256xbf16>
    %cst_44 = arith.constant dense<0.000000e+00> : vector<8x256xf32>
    %76 = tpu.matmul %74, %75, %cst_44 {dimension_numbers = #tpu.dot_dimension_numbers<[1], [0], [0], [1], [0, 0, 1, 1], [], []>} : vector<8x64xbf16>, vector<64x256xbf16>, vector<8x256xf32> -> vector<8x256xf32>
    %c1 = arith.constant 1 : index
    %c0_45 = arith.constant 0 : index
    %c0_46 = arith.constant 0 : index
    %77 = vector.load %arg13[%c1, %c0_45, %c0_46] : memref<8x8x128xf32, #tpu.memory_space<vmem>>, vector<1x8x128xf32>
    %78 = vector.shape_cast %77 : vector<1x8x128xf32> to vector<8x128xf32>
    %79 = vector.extract_strided_slice %76 {offsets = [0, 0], sizes = [8, 128], strides = [1, 1]} : vector<8x256xf32> to vector<8x128xf32>
    %80 = arith.addf %78, %79 : vector<8x128xf32>
    %c0_47 = arith.constant 0 : index
    %c0_48 = arith.constant 0 : index
    %81 = vector.load %arg15[%c0_47, %c0_48] : memref<8x32xf32, #tpu.memory_space<vmem>>, vector<8x32xf32>
    %82 = vector.extract_strided_slice %80 {offsets = [0, 0], sizes = [8, 96], strides = [1, 1]} : vector<8x128xf32> to vector<8x96xf32>
    %cst_49 = arith.constant 5.000000e-01 : f32
    %83 = vector.broadcast %cst_49 : f32 to vector<8x96xf32>
    %84 = arith.mulf %83, %82 : vector<8x96xf32>
    %85 = math.tanh %84 : vector<8x96xf32>
    %cst_50 = arith.constant 5.000000e-01 : f32
    %86 = vector.broadcast %cst_50 : f32 to vector<8x96xf32>
    %87 = arith.mulf %86, %85 : vector<8x96xf32>
    %cst_51 = arith.constant 5.000000e-01 : f32
    %88 = vector.broadcast %cst_51 : f32 to vector<8x96xf32>
    %89 = arith.addf %87, %88 : vector<8x96xf32>
    %90 = vector.extract_strided_slice %89 {offsets = [0, 0], sizes = [8, 32], strides = [1, 1]} : vector<8x96xf32> to vector<8x32xf32>
    %91 = vector.extract_strided_slice %89 {offsets = [0, 32], sizes = [8, 32], strides = [1, 1]} : vector<8x96xf32> to vector<8x32xf32>
    %92 = vector.extract_strided_slice %89 {offsets = [0, 64], sizes = [8, 32], strides = [1, 1]} : vector<8x96xf32> to vector<8x32xf32>
    %93 = vector.extract_strided_slice %80 {offsets = [0, 96], sizes = [8, 32], strides = [1, 1]} : vector<8x128xf32> to vector<8x32xf32>
    %94 = math.tanh %93 : vector<8x32xf32>
    %95 = arith.mulf %91, %81 : vector<8x32xf32>
    %96 = arith.mulf %90, %94 : vector<8x32xf32>
    %97 = arith.addf %95, %96 : vector<8x32xf32>
    %98 = math.tanh %97 : vector<8x32xf32>
    %99 = arith.mulf %92, %98 : vector<8x32xf32>
    %100 = vector.extract_strided_slice %76 {offsets = [0, 128], sizes = [8, 128], strides = [1, 1]} : vector<8x256xf32> to vector<8x128xf32>
    %101 = arith.addf %100, %16 : vector<8x128xf32>
    %102 = arith.truncf %99 : vector<8x32xf32> to vector<8x32xbf16>
    %c0_52 = arith.constant 0 : index
    %c0_53 = arith.constant 0 : index
    %103 = vector.load %arg6[%c0_52, %c0_53] : memref<32x128xbf16, #tpu.memory_space<vmem>>, vector<32x128xbf16>
    %cst_54 = arith.constant dense<0.000000e+00> : vector<8x128xf32>
    %104 = tpu.matmul %102, %103, %cst_54 {dimension_numbers = #tpu.dot_dimension_numbers<[1], [0], [0], [1], [0, 0, 1, 1], [], []>} : vector<8x32xbf16>, vector<32x128xbf16>, vector<8x128xf32> -> vector<8x128xf32>
    %105 = arith.addf %101, %104 : vector<8x128xf32>
    %c0_55 = arith.constant 0 : index
    %c0_56 = arith.constant 0 : index
    %106 = vector.load %arg16[%c0_55, %c0_56] : memref<8x32xf32, #tpu.memory_space<vmem>>, vector<8x32xf32>
    %107 = vector.extract_strided_slice %105 {offsets = [0, 0], sizes = [8, 96], strides = [1, 1]} : vector<8x128xf32> to vector<8x96xf32>
    %cst_57 = arith.constant 5.000000e-01 : f32
    %108 = vector.broadcast %cst_57 : f32 to vector<8x96xf32>
    %109 = arith.mulf %108, %107 : vector<8x96xf32>
    %110 = math.tanh %109 : vector<8x96xf32>
    %cst_58 = arith.constant 5.000000e-01 : f32
    %111 = vector.broadcast %cst_58 : f32 to vector<8x96xf32>
    %112 = arith.mulf %111, %110 : vector<8x96xf32>
    %cst_59 = arith.constant 5.000000e-01 : f32
    %113 = vector.broadcast %cst_59 : f32 to vector<8x96xf32>
    %114 = arith.addf %112, %113 : vector<8x96xf32>
    %115 = vector.extract_strided_slice %114 {offsets = [0, 0], sizes = [8, 32], strides = [1, 1]} : vector<8x96xf32> to vector<8x32xf32>
    %116 = vector.extract_strided_slice %114 {offsets = [0, 32], sizes = [8, 32], strides = [1, 1]} : vector<8x96xf32> to vector<8x32xf32>
    %117 = vector.extract_strided_slice %114 {offsets = [0, 64], sizes = [8, 32], strides = [1, 1]} : vector<8x96xf32> to vector<8x32xf32>
    %118 = vector.extract_strided_slice %105 {offsets = [0, 96], sizes = [8, 32], strides = [1, 1]} : vector<8x128xf32> to vector<8x32xf32>
    %119 = math.tanh %118 : vector<8x32xf32>
    %120 = arith.mulf %116, %106 : vector<8x32xf32>
    %121 = arith.mulf %115, %119 : vector<8x32xf32>
    %122 = arith.addf %120, %121 : vector<8x32xf32>
    %123 = math.tanh %122 : vector<8x32xf32>
    %124 = arith.mulf %117, %123 : vector<8x32xf32>
    %c0_60 = arith.constant 0 : index
    %c0_61 = arith.constant 0 : index
    %125 = vector.load %arg15[%c0_60, %c0_61] : memref<8x32xf32, #tpu.memory_space<vmem>>, vector<8x32xf32>
    tpu.vector_store %arg15[%c0_60, %c0_61], %97 {strides = array<i32>} : memref<8x32xf32, #tpu.memory_space<vmem>>, vector<8x32xf32>,
    %c0_62 = arith.constant 0 : index
    %c0_63 = arith.constant 0 : index
    %126 = vector.load %arg16[%c0_62, %c0_63] : memref<8x32xf32, #tpu.memory_space<vmem>>, vector<8x32xf32>
    tpu.vector_store %arg16[%c0_62, %c0_63], %122 {strides = array<i32>} : memref<8x32xf32, #tpu.memory_space<vmem>>, vector<8x32xf32>,
    %c0_64 = arith.constant 0 : index
    %c0_65 = arith.constant 0 : index
    %127 = vector.load %arg14[%c0_64, %c0_65] : memref<8x64xf32, #tpu.memory_space<vmem>>, vector<8x32xf32>
    tpu.vector_store %arg14[%c0_64, %c0_65], %99 {strides = array<i32>} : memref<8x64xf32, #tpu.memory_space<vmem>>, vector<8x32xf32>,
    %c0_66 = arith.constant 0 : index
    %c32_67 = arith.constant 32 : index
    %128 = vector.load %arg14[%c0_66, %c32_67] : memref<8x64xf32, #tpu.memory_space<vmem>>, vector<8x32xf32>
    tpu.vector_store %arg14[%c0_66, %c32_67], %124 {strides = array<i32>} : memref<8x64xf32, #tpu.memory_space<vmem>>, vector<8x32xf32>,
    %c0_68 = arith.constant 0 : index
    %c0_69 = arith.constant 0 : index
    %129 = vector.load %arg14[%c0_68, %c0_69] : memref<8x64xf32, #tpu.memory_space<vmem>>, vector<8x64xf32>
    %130 = arith.truncf %129 : vector<8x64xf32> to vector<8x64xbf16>
    %c0_70 = arith.constant 0 : index
    %c0_71 = arith.constant 0 : index
    %131 = vector.load %arg5[%c0_70, %c0_71] : memref<64x256xbf16, #tpu.memory_space<vmem>>, vector<64x256xbf16>
    %cst_72 = arith.constant dense<0.000000e+00> : vector<8x256xf32>
    %132 = tpu.matmul %130, %131, %cst_72 {dimension_numbers = #tpu.dot_dimension_numbers<[1], [0], [0], [1], [0, 0, 1, 1], [], []>} : vector<8x64xbf16>, vector<64x256xbf16>, vector<8x256xf32> -> vector<8x256xf32>
    %c2 = arith.constant 2 : index
    %c0_73 = arith.constant 0 : index
    %c0_74 = arith.constant 0 : index
    %133 = vector.load %arg13[%c2, %c0_73, %c0_74] : memref<8x8x128xf32, #tpu.memory_space<vmem>>, vector<1x8x128xf32>
    %134 = vector.shape_cast %133 : vector<1x8x128xf32> to vector<8x128xf32>
    %135 = vector.extract_strided_slice %132 {offsets = [0, 0], sizes = [8, 128], strides = [1, 1]} : vector<8x256xf32> to vector<8x128xf32>
    %136 = arith.addf %134, %135 : vector<8x128xf32>
    %c0_75 = arith.constant 0 : index
    %c0_76 = arith.constant 0 : index
    %137 = vector.load %arg15[%c0_75, %c0_76] : memref<8x32xf32, #tpu.memory_space<vmem>>, vector<8x32xf32>
    %138 = vector.extract_strided_slice %136 {offsets = [0, 0], sizes = [8, 96], strides = [1, 1]} : vector<8x128xf32> to vector<8x96xf32>
    %cst_77 = arith.constant 5.000000e-01 : f32
    %139 = vector.broadcast %cst_77 : f32 to vector<8x96xf32>
    %140 = arith.mulf %139, %138 : vector<8x96xf32>
    %141 = math.tanh %140 : vector<8x96xf32>
    %cst_78 = arith.constant 5.000000e-01 : f32
    %142 = vector.broadcast %cst_78 : f32 to vector<8x96xf32>
    %143 = arith.mulf %142, %141 : vector<8x96xf32>
    %cst_79 = arith.constant 5.000000e-01 : f32
    %144 = vector.broadcast %cst_79 : f32 to vector<8x96xf32>
    %145 = arith.addf %143, %144 : vector<8x96xf32>
    %146 = vector.extract_strided_slice %145 {offsets = [0, 0], sizes = [8, 32], strides = [1, 1]} : vector<8x96xf32> to vector<8x32xf32>
    %147 = vector.extract_strided_slice %145 {offsets = [0, 32], sizes = [8, 32], strides = [1, 1]} : vector<8x96xf32> to vector<8x32xf32>
    %148 = vector.extract_strided_slice %145 {offsets = [0, 64], sizes = [8, 32], strides = [1, 1]} : vector<8x96xf32> to vector<8x32xf32>
    %149 = vector.extract_strided_slice %136 {offsets = [0, 96], sizes = [8, 32], strides = [1, 1]} : vector<8x128xf32> to vector<8x32xf32>
    %150 = math.tanh %149 : vector<8x32xf32>
    %151 = arith.mulf %147, %137 : vector<8x32xf32>
    %152 = arith.mulf %146, %150 : vector<8x32xf32>
    %153 = arith.addf %151, %152 : vector<8x32xf32>
    %154 = math.tanh %153 : vector<8x32xf32>
    %155 = arith.mulf %148, %154 : vector<8x32xf32>
    %156 = vector.extract_strided_slice %132 {offsets = [0, 128], sizes = [8, 128], strides = [1, 1]} : vector<8x256xf32> to vector<8x128xf32>
    %157 = arith.addf %156, %16 : vector<8x128xf32>
    %158 = arith.truncf %155 : vector<8x32xf32> to vector<8x32xbf16>
    %c0_80 = arith.constant 0 : index
    %c0_81 = arith.constant 0 : index
    %159 = vector.load %arg6[%c0_80, %c0_81] : memref<32x128xbf16, #tpu.memory_space<vmem>>, vector<32x128xbf16>
    %cst_82 = arith.constant dense<0.000000e+00> : vector<8x128xf32>
    %160 = tpu.matmul %158, %159, %cst_82 {dimension_numbers = #tpu.dot_dimension_numbers<[1], [0], [0], [1], [0, 0, 1, 1], [], []>} : vector<8x32xbf16>, vector<32x128xbf16>, vector<8x128xf32> -> vector<8x128xf32>
    %161 = arith.addf %157, %160 : vector<8x128xf32>
    %c0_83 = arith.constant 0 : index
    %c0_84 = arith.constant 0 : index
    %162 = vector.load %arg16[%c0_83, %c0_84] : memref<8x32xf32, #tpu.memory_space<vmem>>, vector<8x32xf32>
    %163 = vector.extract_strided_slice %161 {offsets = [0, 0], sizes = [8, 96], strides = [1, 1]} : vector<8x128xf32> to vector<8x96xf32>
    %cst_85 = arith.constant 5.000000e-01 : f32
    %164 = vector.broadcast %cst_85 : f32 to vector<8x96xf32>
    %165 = arith.mulf %164, %163 : vector<8x96xf32>
    %166 = math.tanh %165 : vector<8x96xf32>
    %cst_86 = arith.constant 5.000000e-01 : f32
    %167 = vector.broadcast %cst_86 : f32 to vector<8x96xf32>
    %168 = arith.mulf %167, %166 : vector<8x96xf32>
    %cst_87 = arith.constant 5.000000e-01 : f32
    %169 = vector.broadcast %cst_87 : f32 to vector<8x96xf32>
    %170 = arith.addf %168, %169 : vector<8x96xf32>
    %171 = vector.extract_strided_slice %170 {offsets = [0, 0], sizes = [8, 32], strides = [1, 1]} : vector<8x96xf32> to vector<8x32xf32>
    %172 = vector.extract_strided_slice %170 {offsets = [0, 32], sizes = [8, 32], strides = [1, 1]} : vector<8x96xf32> to vector<8x32xf32>
    %173 = vector.extract_strided_slice %170 {offsets = [0, 64], sizes = [8, 32], strides = [1, 1]} : vector<8x96xf32> to vector<8x32xf32>
    %174 = vector.extract_strided_slice %161 {offsets = [0, 96], sizes = [8, 32], strides = [1, 1]} : vector<8x128xf32> to vector<8x32xf32>
    %175 = math.tanh %174 : vector<8x32xf32>
    %176 = arith.mulf %172, %162 : vector<8x32xf32>
    %177 = arith.mulf %171, %175 : vector<8x32xf32>
    %178 = arith.addf %176, %177 : vector<8x32xf32>
    %179 = math.tanh %178 : vector<8x32xf32>
    %180 = arith.mulf %173, %179 : vector<8x32xf32>
    %c0_88 = arith.constant 0 : index
    %c0_89 = arith.constant 0 : index
    %181 = vector.load %arg15[%c0_88, %c0_89] : memref<8x32xf32, #tpu.memory_space<vmem>>, vector<8x32xf32>
    tpu.vector_store %arg15[%c0_88, %c0_89], %153 {strides = array<i32>} : memref<8x32xf32, #tpu.memory_space<vmem>>, vector<8x32xf32>,
    %c0_90 = arith.constant 0 : index
    %c0_91 = arith.constant 0 : index
    %182 = vector.load %arg16[%c0_90, %c0_91] : memref<8x32xf32, #tpu.memory_space<vmem>>, vector<8x32xf32>
    tpu.vector_store %arg16[%c0_90, %c0_91], %178 {strides = array<i32>} : memref<8x32xf32, #tpu.memory_space<vmem>>, vector<8x32xf32>,
    %c0_92 = arith.constant 0 : index
    %c0_93 = arith.constant 0 : index
    %183 = vector.load %arg14[%c0_92, %c0_93] : memref<8x64xf32, #tpu.memory_space<vmem>>, vector<8x32xf32>
    tpu.vector_store %arg14[%c0_92, %c0_93], %155 {strides = array<i32>} : memref<8x64xf32, #tpu.memory_space<vmem>>, vector<8x32xf32>,
    %c0_94 = arith.constant 0 : index
    %c32_95 = arith.constant 32 : index
    %184 = vector.load %arg14[%c0_94, %c32_95] : memref<8x64xf32, #tpu.memory_space<vmem>>, vector<8x32xf32>
    tpu.vector_store %arg14[%c0_94, %c32_95], %180 {strides = array<i32>} : memref<8x64xf32, #tpu.memory_space<vmem>>, vector<8x32xf32>,
    %c0_96 = arith.constant 0 : index
    %c0_97 = arith.constant 0 : index
    %185 = vector.load %arg14[%c0_96, %c0_97] : memref<8x64xf32, #tpu.memory_space<vmem>>, vector<8x64xf32>
    %186 = arith.truncf %185 : vector<8x64xf32> to vector<8x64xbf16>
    %c0_98 = arith.constant 0 : index
    %c0_99 = arith.constant 0 : index
    %187 = vector.load %arg5[%c0_98, %c0_99] : memref<64x256xbf16, #tpu.memory_space<vmem>>, vector<64x256xbf16>
    %cst_100 = arith.constant dense<0.000000e+00> : vector<8x256xf32>
    %188 = tpu.matmul %186, %187, %cst_100 {dimension_numbers = #tpu.dot_dimension_numbers<[1], [0], [0], [1], [0, 0, 1, 1], [], []>} : vector<8x64xbf16>, vector<64x256xbf16>, vector<8x256xf32> -> vector<8x256xf32>
    %c3 = arith.constant 3 : index
    %c0_101 = arith.constant 0 : index
    %c0_102 = arith.constant 0 : index
    %189 = vector.load %arg13[%c3, %c0_101, %c0_102] : memref<8x8x128xf32, #tpu.memory_space<vmem>>, vector<1x8x128xf32>
    %190 = vector.shape_cast %189 : vector<1x8x128xf32> to vector<8x128xf32>
    %191 = vector.extract_strided_slice %188 {offsets = [0, 0], sizes = [8, 128], strides = [1, 1]} : vector<8x256xf32> to vector<8x128xf32>
    %192 = arith.addf %190, %191 : vector<8x128xf32>
    %c0_103 = arith.constant 0 : index
    %c0_104 = arith.constant 0 : index
    %193 = vector.load %arg15[%c0_103, %c0_104] : memref<8x32xf32, #tpu.memory_space<vmem>>, vector<8x32xf32>
    %194 = vector.extract_strided_slice %192 {offsets = [0, 0], sizes = [8, 96], strides = [1, 1]} : vector<8x128xf32> to vector<8x96xf32>
    %cst_105 = arith.constant 5.000000e-01 : f32
    %195 = vector.broadcast %cst_105 : f32 to vector<8x96xf32>
    %196 = arith.mulf %195, %194 : vector<8x96xf32>
    %197 = math.tanh %196 : vector<8x96xf32>
    %cst_106 = arith.constant 5.000000e-01 : f32
    %198 = vector.broadcast %cst_106 : f32 to vector<8x96xf32>
    %199 = arith.mulf %198, %197 : vector<8x96xf32>
    %cst_107 = arith.constant 5.000000e-01 : f32
    %200 = vector.broadcast %cst_107 : f32 to vector<8x96xf32>
    %201 = arith.addf %199, %200 : vector<8x96xf32>
    %202 = vector.extract_strided_slice %201 {offsets = [0, 0], sizes = [8, 32], strides = [1, 1]} : vector<8x96xf32> to vector<8x32xf32>
    %203 = vector.extract_strided_slice %201 {offsets = [0, 32], sizes = [8, 32], strides = [1, 1]} : vector<8x96xf32> to vector<8x32xf32>
    %204 = vector.extract_strided_slice %201 {offsets = [0, 64], sizes = [8, 32], strides = [1, 1]} : vector<8x96xf32> to vector<8x32xf32>
    %205 = vector.extract_strided_slice %192 {offsets = [0, 96], sizes = [8, 32], strides = [1, 1]} : vector<8x128xf32> to vector<8x32xf32>
    %206 = math.tanh %205 : vector<8x32xf32>
    %207 = arith.mulf %203, %193 : vector<8x32xf32>
    %208 = arith.mulf %202, %206 : vector<8x32xf32>
    %209 = arith.addf %207, %208 : vector<8x32xf32>
    %210 = math.tanh %209 : vector<8x32xf32>
    %211 = arith.mulf %204, %210 : vector<8x32xf32>
    %212 = vector.extract_strided_slice %188 {offsets = [0, 128], sizes = [8, 128], strides = [1, 1]} : vector<8x256xf32> to vector<8x128xf32>
    %213 = arith.addf %212, %16 : vector<8x128xf32>
    %214 = arith.truncf %211 : vector<8x32xf32> to vector<8x32xbf16>
    %c0_108 = arith.constant 0 : index
    %c0_109 = arith.constant 0 : index
    %215 = vector.load %arg6[%c0_108, %c0_109] : memref<32x128xbf16, #tpu.memory_space<vmem>>, vector<32x128xbf16>
    %cst_110 = arith.constant dense<0.000000e+00> : vector<8x128xf32>
    %216 = tpu.matmul %214, %215, %cst_110 {dimension_numbers = #tpu.dot_dimension_numbers<[1], [0], [0], [1], [0, 0, 1, 1], [], []>} : vector<8x32xbf16>, vector<32x128xbf16>, vector<8x128xf32> -> vector<8x128xf32>
    %217 = arith.addf %213, %216 : vector<8x128xf32>
    %c0_111 = arith.constant 0 : index
    %c0_112 = arith.constant 0 : index
    %218 = vector.load %arg16[%c0_111, %c0_112] : memref<8x32xf32, #tpu.memory_space<vmem>>, vector<8x32xf32>
    %219 = vector.extract_strided_slice %217 {offsets = [0, 0], sizes = [8, 96], strides = [1, 1]} : vector<8x128xf32> to vector<8x96xf32>
    %cst_113 = arith.constant 5.000000e-01 : f32
    %220 = vector.broadcast %cst_113 : f32 to vector<8x96xf32>
    %221 = arith.mulf %220, %219 : vector<8x96xf32>
    %222 = math.tanh %221 : vector<8x96xf32>
    %cst_114 = arith.constant 5.000000e-01 : f32
    %223 = vector.broadcast %cst_114 : f32 to vector<8x96xf32>
    %224 = arith.mulf %223, %222 : vector<8x96xf32>
    %cst_115 = arith.constant 5.000000e-01 : f32
    %225 = vector.broadcast %cst_115 : f32 to vector<8x96xf32>
    %226 = arith.addf %224, %225 : vector<8x96xf32>
    %227 = vector.extract_strided_slice %226 {offsets = [0, 0], sizes = [8, 32], strides = [1, 1]} : vector<8x96xf32> to vector<8x32xf32>
    %228 = vector.extract_strided_slice %226 {offsets = [0, 32], sizes = [8, 32], strides = [1, 1]} : vector<8x96xf32> to vector<8x32xf32>
    %229 = vector.extract_strided_slice %226 {offsets = [0, 64], sizes = [8, 32], strides = [1, 1]} : vector<8x96xf32> to vector<8x32xf32>
    %230 = vector.extract_strided_slice %217 {offsets = [0, 96], sizes = [8, 32], strides = [1, 1]} : vector<8x128xf32> to vector<8x32xf32>
    %231 = math.tanh %230 : vector<8x32xf32>
    %232 = arith.mulf %228, %218 : vector<8x32xf32>
    %233 = arith.mulf %227, %231 : vector<8x32xf32>
    %234 = arith.addf %232, %233 : vector<8x32xf32>
    %235 = math.tanh %234 : vector<8x32xf32>
    %236 = arith.mulf %229, %235 : vector<8x32xf32>
    %c0_116 = arith.constant 0 : index
    %c0_117 = arith.constant 0 : index
    %237 = vector.load %arg15[%c0_116, %c0_117] : memref<8x32xf32, #tpu.memory_space<vmem>>, vector<8x32xf32>
    tpu.vector_store %arg15[%c0_116, %c0_117], %209 {strides = array<i32>} : memref<8x32xf32, #tpu.memory_space<vmem>>, vector<8x32xf32>,
    %c0_118 = arith.constant 0 : index
    %c0_119 = arith.constant 0 : index
    %238 = vector.load %arg16[%c0_118, %c0_119] : memref<8x32xf32, #tpu.memory_space<vmem>>, vector<8x32xf32>
    tpu.vector_store %arg16[%c0_118, %c0_119], %234 {strides = array<i32>} : memref<8x32xf32, #tpu.memory_space<vmem>>, vector<8x32xf32>,
    %c0_120 = arith.constant 0 : index
    %c0_121 = arith.constant 0 : index
    %239 = vector.load %arg14[%c0_120, %c0_121] : memref<8x64xf32, #tpu.memory_space<vmem>>, vector<8x32xf32>
    tpu.vector_store %arg14[%c0_120, %c0_121], %211 {strides = array<i32>} : memref<8x64xf32, #tpu.memory_space<vmem>>, vector<8x32xf32>,
    %c0_122 = arith.constant 0 : index
    %c32_123 = arith.constant 32 : index
    %240 = vector.load %arg14[%c0_122, %c32_123] : memref<8x64xf32, #tpu.memory_space<vmem>>, vector<8x32xf32>
    tpu.vector_store %arg14[%c0_122, %c32_123], %236 {strides = array<i32>} : memref<8x64xf32, #tpu.memory_space<vmem>>, vector<8x32xf32>,
    %c0_124 = arith.constant 0 : index
    %c0_125 = arith.constant 0 : index
    %241 = vector.load %arg14[%c0_124, %c0_125] : memref<8x64xf32, #tpu.memory_space<vmem>>, vector<8x64xf32>
    %242 = arith.truncf %241 : vector<8x64xf32> to vector<8x64xbf16>
    %c0_126 = arith.constant 0 : index
    %c0_127 = arith.constant 0 : index
    %243 = vector.load %arg5[%c0_126, %c0_127] : memref<64x256xbf16, #tpu.memory_space<vmem>>, vector<64x256xbf16>
    %cst_128 = arith.constant dense<0.000000e+00> : vector<8x256xf32>
    %244 = tpu.matmul %242, %243, %cst_128 {dimension_numbers = #tpu.dot_dimension_numbers<[1], [0], [0], [1], [0, 0, 1, 1], [], []>} : vector<8x64xbf16>, vector<64x256xbf16>, vector<8x256xf32> -> vector<8x256xf32>
    %c4 = arith.constant 4 : index
    %c0_129 = arith.constant 0 : index
    %c0_130 = arith.constant 0 : index
    %245 = vector.load %arg13[%c4, %c0_129, %c0_130] : memref<8x8x128xf32, #tpu.memory_space<vmem>>, vector<1x8x128xf32>
    %246 = vector.shape_cast %245 : vector<1x8x128xf32> to vector<8x128xf32>
    %247 = vector.extract_strided_slice %244 {offsets = [0, 0], sizes = [8, 128], strides = [1, 1]} : vector<8x256xf32> to vector<8x128xf32>
    %248 = arith.addf %246, %247 : vector<8x128xf32>
    %c0_131 = arith.constant 0 : index
    %c0_132 = arith.constant 0 : index
    %249 = vector.load %arg15[%c0_131, %c0_132] : memref<8x32xf32, #tpu.memory_space<vmem>>, vector<8x32xf32>
    %250 = vector.extract_strided_slice %248 {offsets = [0, 0], sizes = [8, 96], strides = [1, 1]} : vector<8x128xf32> to vector<8x96xf32>
    %cst_133 = arith.constant 5.000000e-01 : f32
    %251 = vector.broadcast %cst_133 : f32 to vector<8x96xf32>
    %252 = arith.mulf %251, %250 : vector<8x96xf32>
    %253 = math.tanh %252 : vector<8x96xf32>
    %cst_134 = arith.constant 5.000000e-01 : f32
    %254 = vector.broadcast %cst_134 : f32 to vector<8x96xf32>
    %255 = arith.mulf %254, %253 : vector<8x96xf32>
    %cst_135 = arith.constant 5.000000e-01 : f32
    %256 = vector.broadcast %cst_135 : f32 to vector<8x96xf32>
    %257 = arith.addf %255, %256 : vector<8x96xf32>
    %258 = vector.extract_strided_slice %257 {offsets = [0, 0], sizes = [8, 32], strides = [1, 1]} : vector<8x96xf32> to vector<8x32xf32>
    %259 = vector.extract_strided_slice %257 {offsets = [0, 32], sizes = [8, 32], strides = [1, 1]} : vector<8x96xf32> to vector<8x32xf32>
    %260 = vector.extract_strided_slice %257 {offsets = [0, 64], sizes = [8, 32], strides = [1, 1]} : vector<8x96xf32> to vector<8x32xf32>
    %261 = vector.extract_strided_slice %248 {offsets = [0, 96], sizes = [8, 32], strides = [1, 1]} : vector<8x128xf32> to vector<8x32xf32>
    %262 = math.tanh %261 : vector<8x32xf32>
    %263 = arith.mulf %259, %249 : vector<8x32xf32>
    %264 = arith.mulf %258, %262 : vector<8x32xf32>
    %265 = arith.addf %263, %264 : vector<8x32xf32>
    %266 = math.tanh %265 : vector<8x32xf32>
    %267 = arith.mulf %260, %266 : vector<8x32xf32>
    %268 = vector.extract_strided_slice %244 {offsets = [0, 128], sizes = [8, 128], strides = [1, 1]} : vector<8x256xf32> to vector<8x128xf32>
    %269 = arith.addf %268, %16 : vector<8x128xf32>
    %270 = arith.truncf %267 : vector<8x32xf32> to vector<8x32xbf16>
    %c0_136 = arith.constant 0 : index
    %c0_137 = arith.constant 0 : index
    %271 = vector.load %arg6[%c0_136, %c0_137] : memref<32x128xbf16, #tpu.memory_space<vmem>>, vector<32x128xbf16>
    %cst_138 = arith.constant dense<0.000000e+00> : vector<8x128xf32>
    %272 = tpu.matmul %270, %271, %cst_138 {dimension_numbers = #tpu.dot_dimension_numbers<[1], [0], [0], [1], [0, 0, 1, 1], [], []>} : vector<8x32xbf16>, vector<32x128xbf16>, vector<8x128xf32> -> vector<8x128xf32>
    %273 = arith.addf %269, %272 : vector<8x128xf32>
    %c0_139 = arith.constant 0 : index
    %c0_140 = arith.constant 0 : index
    %274 = vector.load %arg16[%c0_139, %c0_140] : memref<8x32xf32, #tpu.memory_space<vmem>>, vector<8x32xf32>
    %275 = vector.extract_strided_slice %273 {offsets = [0, 0], sizes = [8, 96], strides = [1, 1]} : vector<8x128xf32> to vector<8x96xf32>
    %cst_141 = arith.constant 5.000000e-01 : f32
    %276 = vector.broadcast %cst_141 : f32 to vector<8x96xf32>
    %277 = arith.mulf %276, %275 : vector<8x96xf32>
    %278 = math.tanh %277 : vector<8x96xf32>
    %cst_142 = arith.constant 5.000000e-01 : f32
    %279 = vector.broadcast %cst_142 : f32 to vector<8x96xf32>
    %280 = arith.mulf %279, %278 : vector<8x96xf32>
    %cst_143 = arith.constant 5.000000e-01 : f32
    %281 = vector.broadcast %cst_143 : f32 to vector<8x96xf32>
    %282 = arith.addf %280, %281 : vector<8x96xf32>
    %283 = vector.extract_strided_slice %282 {offsets = [0, 0], sizes = [8, 32], strides = [1, 1]} : vector<8x96xf32> to vector<8x32xf32>
    %284 = vector.extract_strided_slice %282 {offsets = [0, 32], sizes = [8, 32], strides = [1, 1]} : vector<8x96xf32> to vector<8x32xf32>
    %285 = vector.extract_strided_slice %282 {offsets = [0, 64], sizes = [8, 32], strides = [1, 1]} : vector<8x96xf32> to vector<8x32xf32>
    %286 = vector.extract_strided_slice %273 {offsets = [0, 96], sizes = [8, 32], strides = [1, 1]} : vector<8x128xf32> to vector<8x32xf32>
    %287 = math.tanh %286 : vector<8x32xf32>
    %288 = arith.mulf %284, %274 : vector<8x32xf32>
    %289 = arith.mulf %283, %287 : vector<8x32xf32>
    %290 = arith.addf %288, %289 : vector<8x32xf32>
    %291 = math.tanh %290 : vector<8x32xf32>
    %292 = arith.mulf %285, %291 : vector<8x32xf32>
    %c0_144 = arith.constant 0 : index
    %c0_145 = arith.constant 0 : index
    %293 = vector.load %arg15[%c0_144, %c0_145] : memref<8x32xf32, #tpu.memory_space<vmem>>, vector<8x32xf32>
    tpu.vector_store %arg15[%c0_144, %c0_145], %265 {strides = array<i32>} : memref<8x32xf32, #tpu.memory_space<vmem>>, vector<8x32xf32>,
    %c0_146 = arith.constant 0 : index
    %c0_147 = arith.constant 0 : index
    %294 = vector.load %arg16[%c0_146, %c0_147] : memref<8x32xf32, #tpu.memory_space<vmem>>, vector<8x32xf32>
    tpu.vector_store %arg16[%c0_146, %c0_147], %290 {strides = array<i32>} : memref<8x32xf32, #tpu.memory_space<vmem>>, vector<8x32xf32>,
    %c0_148 = arith.constant 0 : index
    %c0_149 = arith.constant 0 : index
    %295 = vector.load %arg14[%c0_148, %c0_149] : memref<8x64xf32, #tpu.memory_space<vmem>>, vector<8x32xf32>
    tpu.vector_store %arg14[%c0_148, %c0_149], %267 {strides = array<i32>} : memref<8x64xf32, #tpu.memory_space<vmem>>, vector<8x32xf32>,
    %c0_150 = arith.constant 0 : index
    %c32_151 = arith.constant 32 : index
    %296 = vector.load %arg14[%c0_150, %c32_151] : memref<8x64xf32, #tpu.memory_space<vmem>>, vector<8x32xf32>
    tpu.vector_store %arg14[%c0_150, %c32_151], %292 {strides = array<i32>} : memref<8x64xf32, #tpu.memory_space<vmem>>, vector<8x32xf32>,
    %c0_152 = arith.constant 0 : index
    %c0_153 = arith.constant 0 : index
    %297 = vector.load %arg14[%c0_152, %c0_153] : memref<8x64xf32, #tpu.memory_space<vmem>>, vector<8x64xf32>
    %298 = arith.truncf %297 : vector<8x64xf32> to vector<8x64xbf16>
    %c0_154 = arith.constant 0 : index
    %c0_155 = arith.constant 0 : index
    %299 = vector.load %arg5[%c0_154, %c0_155] : memref<64x256xbf16, #tpu.memory_space<vmem>>, vector<64x256xbf16>
    %cst_156 = arith.constant dense<0.000000e+00> : vector<8x256xf32>
    %300 = tpu.matmul %298, %299, %cst_156 {dimension_numbers = #tpu.dot_dimension_numbers<[1], [0], [0], [1], [0, 0, 1, 1], [], []>} : vector<8x64xbf16>, vector<64x256xbf16>, vector<8x256xf32> -> vector<8x256xf32>
    %c5 = arith.constant 5 : index
    %c0_157 = arith.constant 0 : index
    %c0_158 = arith.constant 0 : index
    %301 = vector.load %arg13[%c5, %c0_157, %c0_158] : memref<8x8x128xf32, #tpu.memory_space<vmem>>, vector<1x8x128xf32>
    %302 = vector.shape_cast %301 : vector<1x8x128xf32> to vector<8x128xf32>
    %303 = vector.extract_strided_slice %300 {offsets = [0, 0], sizes = [8, 128], strides = [1, 1]} : vector<8x256xf32> to vector<8x128xf32>
    %304 = arith.addf %302, %303 : vector<8x128xf32>
    %c0_159 = arith.constant 0 : index
    %c0_160 = arith.constant 0 : index
    %305 = vector.load %arg15[%c0_159, %c0_160] : memref<8x32xf32, #tpu.memory_space<vmem>>, vector<8x32xf32>
    %306 = vector.extract_strided_slice %304 {offsets = [0, 0], sizes = [8, 96], strides = [1, 1]} : vector<8x128xf32> to vector<8x96xf32>
    %cst_161 = arith.constant 5.000000e-01 : f32
    %307 = vector.broadcast %cst_161 : f32 to vector<8x96xf32>
    %308 = arith.mulf %307, %306 : vector<8x96xf32>
    %309 = math.tanh %308 : vector<8x96xf32>
    %cst_162 = arith.constant 5.000000e-01 : f32
    %310 = vector.broadcast %cst_162 : f32 to vector<8x96xf32>
    %311 = arith.mulf %310, %309 : vector<8x96xf32>
    %cst_163 = arith.constant 5.000000e-01 : f32
    %312 = vector.broadcast %cst_163 : f32 to vector<8x96xf32>
    %313 = arith.addf %311, %312 : vector<8x96xf32>
    %314 = vector.extract_strided_slice %313 {offsets = [0, 0], sizes = [8, 32], strides = [1, 1]} : vector<8x96xf32> to vector<8x32xf32>
    %315 = vector.extract_strided_slice %313 {offsets = [0, 32], sizes = [8, 32], strides = [1, 1]} : vector<8x96xf32> to vector<8x32xf32>
    %316 = vector.extract_strided_slice %313 {offsets = [0, 64], sizes = [8, 32], strides = [1, 1]} : vector<8x96xf32> to vector<8x32xf32>
    %317 = vector.extract_strided_slice %304 {offsets = [0, 96], sizes = [8, 32], strides = [1, 1]} : vector<8x128xf32> to vector<8x32xf32>
    %318 = math.tanh %317 : vector<8x32xf32>
    %319 = arith.mulf %315, %305 : vector<8x32xf32>
    %320 = arith.mulf %314, %318 : vector<8x32xf32>
    %321 = arith.addf %319, %320 : vector<8x32xf32>
    %322 = math.tanh %321 : vector<8x32xf32>
    %323 = arith.mulf %316, %322 : vector<8x32xf32>
    %324 = vector.extract_strided_slice %300 {offsets = [0, 128], sizes = [8, 128], strides = [1, 1]} : vector<8x256xf32> to vector<8x128xf32>
    %325 = arith.addf %324, %16 : vector<8x128xf32>
    %326 = arith.truncf %323 : vector<8x32xf32> to vector<8x32xbf16>
    %c0_164 = arith.constant 0 : index
    %c0_165 = arith.constant 0 : index
    %327 = vector.load %arg6[%c0_164, %c0_165] : memref<32x128xbf16, #tpu.memory_space<vmem>>, vector<32x128xbf16>
    %cst_166 = arith.constant dense<0.000000e+00> : vector<8x128xf32>
    %328 = tpu.matmul %326, %327, %cst_166 {dimension_numbers = #tpu.dot_dimension_numbers<[1], [0], [0], [1], [0, 0, 1, 1], [], []>} : vector<8x32xbf16>, vector<32x128xbf16>, vector<8x128xf32> -> vector<8x128xf32>
    %329 = arith.addf %325, %328 : vector<8x128xf32>
    %c0_167 = arith.constant 0 : index
    %c0_168 = arith.constant 0 : index
    %330 = vector.load %arg16[%c0_167, %c0_168] : memref<8x32xf32, #tpu.memory_space<vmem>>, vector<8x32xf32>
    %331 = vector.extract_strided_slice %329 {offsets = [0, 0], sizes = [8, 96], strides = [1, 1]} : vector<8x128xf32> to vector<8x96xf32>
    %cst_169 = arith.constant 5.000000e-01 : f32
    %332 = vector.broadcast %cst_169 : f32 to vector<8x96xf32>
    %333 = arith.mulf %332, %331 : vector<8x96xf32>
    %334 = math.tanh %333 : vector<8x96xf32>
    %cst_170 = arith.constant 5.000000e-01 : f32
    %335 = vector.broadcast %cst_170 : f32 to vector<8x96xf32>
    %336 = arith.mulf %335, %334 : vector<8x96xf32>
    %cst_171 = arith.constant 5.000000e-01 : f32
    %337 = vector.broadcast %cst_171 : f32 to vector<8x96xf32>
    %338 = arith.addf %336, %337 : vector<8x96xf32>
    %339 = vector.extract_strided_slice %338 {offsets = [0, 0], sizes = [8, 32], strides = [1, 1]} : vector<8x96xf32> to vector<8x32xf32>
    %340 = vector.extract_strided_slice %338 {offsets = [0, 32], sizes = [8, 32], strides = [1, 1]} : vector<8x96xf32> to vector<8x32xf32>
    %341 = vector.extract_strided_slice %338 {offsets = [0, 64], sizes = [8, 32], strides = [1, 1]} : vector<8x96xf32> to vector<8x32xf32>
    %342 = vector.extract_strided_slice %329 {offsets = [0, 96], sizes = [8, 32], strides = [1, 1]} : vector<8x128xf32> to vector<8x32xf32>
    %343 = math.tanh %342 : vector<8x32xf32>
    %344 = arith.mulf %340, %330 : vector<8x32xf32>
    %345 = arith.mulf %339, %343 : vector<8x32xf32>
    %346 = arith.addf %344, %345 : vector<8x32xf32>
    %347 = math.tanh %346 : vector<8x32xf32>
    %348 = arith.mulf %341, %347 : vector<8x32xf32>
    %c0_172 = arith.constant 0 : index
    %c0_173 = arith.constant 0 : index
    %349 = vector.load %arg15[%c0_172, %c0_173] : memref<8x32xf32, #tpu.memory_space<vmem>>, vector<8x32xf32>
    tpu.vector_store %arg15[%c0_172, %c0_173], %321 {strides = array<i32>} : memref<8x32xf32, #tpu.memory_space<vmem>>, vector<8x32xf32>,
    %c0_174 = arith.constant 0 : index
    %c0_175 = arith.constant 0 : index
    %350 = vector.load %arg16[%c0_174, %c0_175] : memref<8x32xf32, #tpu.memory_space<vmem>>, vector<8x32xf32>
    tpu.vector_store %arg16[%c0_174, %c0_175], %346 {strides = array<i32>} : memref<8x32xf32, #tpu.memory_space<vmem>>, vector<8x32xf32>,
    %c0_176 = arith.constant 0 : index
    %c0_177 = arith.constant 0 : index
    %351 = vector.load %arg14[%c0_176, %c0_177] : memref<8x64xf32, #tpu.memory_space<vmem>>, vector<8x32xf32>
    tpu.vector_store %arg14[%c0_176, %c0_177], %323 {strides = array<i32>} : memref<8x64xf32, #tpu.memory_space<vmem>>, vector<8x32xf32>,
    %c0_178 = arith.constant 0 : index
    %c32_179 = arith.constant 32 : index
    %352 = vector.load %arg14[%c0_178, %c32_179] : memref<8x64xf32, #tpu.memory_space<vmem>>, vector<8x32xf32>
    tpu.vector_store %arg14[%c0_178, %c32_179], %348 {strides = array<i32>} : memref<8x64xf32, #tpu.memory_space<vmem>>, vector<8x32xf32>,
    %c0_180 = arith.constant 0 : index
    %c0_181 = arith.constant 0 : index
    %353 = vector.load %arg14[%c0_180, %c0_181] : memref<8x64xf32, #tpu.memory_space<vmem>>, vector<8x64xf32>
    %354 = arith.truncf %353 : vector<8x64xf32> to vector<8x64xbf16>
    %c0_182 = arith.constant 0 : index
    %c0_183 = arith.constant 0 : index
    %355 = vector.load %arg5[%c0_182, %c0_183] : memref<64x256xbf16, #tpu.memory_space<vmem>>, vector<64x256xbf16>
    %cst_184 = arith.constant dense<0.000000e+00> : vector<8x256xf32>
    %356 = tpu.matmul %354, %355, %cst_184 {dimension_numbers = #tpu.dot_dimension_numbers<[1], [0], [0], [1], [0, 0, 1, 1], [], []>} : vector<8x64xbf16>, vector<64x256xbf16>, vector<8x256xf32> -> vector<8x256xf32>
    %c6 = arith.constant 6 : index
    %c0_185 = arith.constant 0 : index
    %c0_186 = arith.constant 0 : index
    %357 = vector.load %arg13[%c6, %c0_185, %c0_186] : memref<8x8x128xf32, #tpu.memory_space<vmem>>, vector<1x8x128xf32>
    %358 = vector.shape_cast %357 : vector<1x8x128xf32> to vector<8x128xf32>
    %359 = vector.extract_strided_slice %356 {offsets = [0, 0], sizes = [8, 128], strides = [1, 1]} : vector<8x256xf32> to vector<8x128xf32>
    %360 = arith.addf %358, %359 : vector<8x128xf32>
    %c0_187 = arith.constant 0 : index
    %c0_188 = arith.constant 0 : index
    %361 = vector.load %arg15[%c0_187, %c0_188] : memref<8x32xf32, #tpu.memory_space<vmem>>, vector<8x32xf32>
    %362 = vector.extract_strided_slice %360 {offsets = [0, 0], sizes = [8, 96], strides = [1, 1]} : vector<8x128xf32> to vector<8x96xf32>
    %cst_189 = arith.constant 5.000000e-01 : f32
    %363 = vector.broadcast %cst_189 : f32 to vector<8x96xf32>
    %364 = arith.mulf %363, %362 : vector<8x96xf32>
    %365 = math.tanh %364 : vector<8x96xf32>
    %cst_190 = arith.constant 5.000000e-01 : f32
    %366 = vector.broadcast %cst_190 : f32 to vector<8x96xf32>
    %367 = arith.mulf %366, %365 : vector<8x96xf32>
    %cst_191 = arith.constant 5.000000e-01 : f32
    %368 = vector.broadcast %cst_191 : f32 to vector<8x96xf32>
    %369 = arith.addf %367, %368 : vector<8x96xf32>
    %370 = vector.extract_strided_slice %369 {offsets = [0, 0], sizes = [8, 32], strides = [1, 1]} : vector<8x96xf32> to vector<8x32xf32>
    %371 = vector.extract_strided_slice %369 {offsets = [0, 32], sizes = [8, 32], strides = [1, 1]} : vector<8x96xf32> to vector<8x32xf32>
    %372 = vector.extract_strided_slice %369 {offsets = [0, 64], sizes = [8, 32], strides = [1, 1]} : vector<8x96xf32> to vector<8x32xf32>
    %373 = vector.extract_strided_slice %360 {offsets = [0, 96], sizes = [8, 32], strides = [1, 1]} : vector<8x128xf32> to vector<8x32xf32>
    %374 = math.tanh %373 : vector<8x32xf32>
    %375 = arith.mulf %371, %361 : vector<8x32xf32>
    %376 = arith.mulf %370, %374 : vector<8x32xf32>
    %377 = arith.addf %375, %376 : vector<8x32xf32>
    %378 = math.tanh %377 : vector<8x32xf32>
    %379 = arith.mulf %372, %378 : vector<8x32xf32>
    %380 = vector.extract_strided_slice %356 {offsets = [0, 128], sizes = [8, 128], strides = [1, 1]} : vector<8x256xf32> to vector<8x128xf32>
    %381 = arith.addf %380, %16 : vector<8x128xf32>
    %382 = arith.truncf %379 : vector<8x32xf32> to vector<8x32xbf16>
    %c0_192 = arith.constant 0 : index
    %c0_193 = arith.constant 0 : index
    %383 = vector.load %arg6[%c0_192, %c0_193] : memref<32x128xbf16, #tpu.memory_space<vmem>>, vector<32x128xbf16>
    %cst_194 = arith.constant dense<0.000000e+00> : vector<8x128xf32>
    %384 = tpu.matmul %382, %383, %cst_194 {dimension_numbers = #tpu.dot_dimension_numbers<[1], [0], [0], [1], [0, 0, 1, 1], [], []>} : vector<8x32xbf16>, vector<32x128xbf16>, vector<8x128xf32> -> vector<8x128xf32>
    %385 = arith.addf %381, %384 : vector<8x128xf32>
    %c0_195 = arith.constant 0 : index
    %c0_196 = arith.constant 0 : index
    %386 = vector.load %arg16[%c0_195, %c0_196] : memref<8x32xf32, #tpu.memory_space<vmem>>, vector<8x32xf32>
    %387 = vector.extract_strided_slice %385 {offsets = [0, 0], sizes = [8, 96], strides = [1, 1]} : vector<8x128xf32> to vector<8x96xf32>
    %cst_197 = arith.constant 5.000000e-01 : f32
    %388 = vector.broadcast %cst_197 : f32 to vector<8x96xf32>
    %389 = arith.mulf %388, %387 : vector<8x96xf32>
    %390 = math.tanh %389 : vector<8x96xf32>
    %cst_198 = arith.constant 5.000000e-01 : f32
    %391 = vector.broadcast %cst_198 : f32 to vector<8x96xf32>
    %392 = arith.mulf %391, %390 : vector<8x96xf32>
    %cst_199 = arith.constant 5.000000e-01 : f32
    %393 = vector.broadcast %cst_199 : f32 to vector<8x96xf32>
    %394 = arith.addf %392, %393 : vector<8x96xf32>
    %395 = vector.extract_strided_slice %394 {offsets = [0, 0], sizes = [8, 32], strides = [1, 1]} : vector<8x96xf32> to vector<8x32xf32>
    %396 = vector.extract_strided_slice %394 {offsets = [0, 32], sizes = [8, 32], strides = [1, 1]} : vector<8x96xf32> to vector<8x32xf32>
    %397 = vector.extract_strided_slice %394 {offsets = [0, 64], sizes = [8, 32], strides = [1, 1]} : vector<8x96xf32> to vector<8x32xf32>
    %398 = vector.extract_strided_slice %385 {offsets = [0, 96], sizes = [8, 32], strides = [1, 1]} : vector<8x128xf32> to vector<8x32xf32>
    %399 = math.tanh %398 : vector<8x32xf32>
    %400 = arith.mulf %396, %386 : vector<8x32xf32>
    %401 = arith.mulf %395, %399 : vector<8x32xf32>
    %402 = arith.addf %400, %401 : vector<8x32xf32>
    %403 = math.tanh %402 : vector<8x32xf32>
    %404 = arith.mulf %397, %403 : vector<8x32xf32>
    %c0_200 = arith.constant 0 : index
    %c0_201 = arith.constant 0 : index
    %405 = vector.load %arg15[%c0_200, %c0_201] : memref<8x32xf32, #tpu.memory_space<vmem>>, vector<8x32xf32>
    tpu.vector_store %arg15[%c0_200, %c0_201], %377 {strides = array<i32>} : memref<8x32xf32, #tpu.memory_space<vmem>>, vector<8x32xf32>,
    %c0_202 = arith.constant 0 : index
    %c0_203 = arith.constant 0 : index
    %406 = vector.load %arg16[%c0_202, %c0_203] : memref<8x32xf32, #tpu.memory_space<vmem>>, vector<8x32xf32>
    tpu.vector_store %arg16[%c0_202, %c0_203], %402 {strides = array<i32>} : memref<8x32xf32, #tpu.memory_space<vmem>>, vector<8x32xf32>,
    %c0_204 = arith.constant 0 : index
    %c0_205 = arith.constant 0 : index
    %407 = vector.load %arg14[%c0_204, %c0_205] : memref<8x64xf32, #tpu.memory_space<vmem>>, vector<8x32xf32>
    tpu.vector_store %arg14[%c0_204, %c0_205], %379 {strides = array<i32>} : memref<8x64xf32, #tpu.memory_space<vmem>>, vector<8x32xf32>,
    %c0_206 = arith.constant 0 : index
    %c32_207 = arith.constant 32 : index
    %408 = vector.load %arg14[%c0_206, %c32_207] : memref<8x64xf32, #tpu.memory_space<vmem>>, vector<8x32xf32>
    tpu.vector_store %arg14[%c0_206, %c32_207], %404 {strides = array<i32>} : memref<8x64xf32, #tpu.memory_space<vmem>>, vector<8x32xf32>,
    %c0_208 = arith.constant 0 : index
    %c0_209 = arith.constant 0 : index
    %409 = vector.load %arg14[%c0_208, %c0_209] : memref<8x64xf32, #tpu.memory_space<vmem>>, vector<8x64xf32>
    %410 = arith.truncf %409 : vector<8x64xf32> to vector<8x64xbf16>
    %c0_210 = arith.constant 0 : index
    %c0_211 = arith.constant 0 : index
    %411 = vector.load %arg5[%c0_210, %c0_211] : memref<64x256xbf16, #tpu.memory_space<vmem>>, vector<64x256xbf16>
    %cst_212 = arith.constant dense<0.000000e+00> : vector<8x256xf32>
    %412 = tpu.matmul %410, %411, %cst_212 {dimension_numbers = #tpu.dot_dimension_numbers<[1], [0], [0], [1], [0, 0, 1, 1], [], []>} : vector<8x64xbf16>, vector<64x256xbf16>, vector<8x256xf32> -> vector<8x256xf32>
    %c7 = arith.constant 7 : index
    %c0_213 = arith.constant 0 : index
    %c0_214 = arith.constant 0 : index
    %413 = vector.load %arg13[%c7, %c0_213, %c0_214] : memref<8x8x128xf32, #tpu.memory_space<vmem>>, vector<1x8x128xf32>
    %414 = vector.shape_cast %413 : vector<1x8x128xf32> to vector<8x128xf32>
    %415 = vector.extract_strided_slice %412 {offsets = [0, 0], sizes = [8, 128], strides = [1, 1]} : vector<8x256xf32> to vector<8x128xf32>
    %416 = arith.addf %414, %415 : vector<8x128xf32>
    %c0_215 = arith.constant 0 : index
    %c0_216 = arith.constant 0 : index
    %417 = vector.load %arg15[%c0_215, %c0_216] : memref<8x32xf32, #tpu.memory_space<vmem>>, vector<8x32xf32>
    %418 = vector.extract_strided_slice %416 {offsets = [0, 0], sizes = [8, 96], strides = [1, 1]} : vector<8x128xf32> to vector<8x96xf32>
    %cst_217 = arith.constant 5.000000e-01 : f32
    %419 = vector.broadcast %cst_217 : f32 to vector<8x96xf32>
    %420 = arith.mulf %419, %418 : vector<8x96xf32>
    %421 = math.tanh %420 : vector<8x96xf32>
    %cst_218 = arith.constant 5.000000e-01 : f32
    %422 = vector.broadcast %cst_218 : f32 to vector<8x96xf32>
    %423 = arith.mulf %422, %421 : vector<8x96xf32>
    %cst_219 = arith.constant 5.000000e-01 : f32
    %424 = vector.broadcast %cst_219 : f32 to vector<8x96xf32>
    %425 = arith.addf %423, %424 : vector<8x96xf32>
    %426 = vector.extract_strided_slice %425 {offsets = [0, 0], sizes = [8, 32], strides = [1, 1]} : vector<8x96xf32> to vector<8x32xf32>
    %427 = vector.extract_strided_slice %425 {offsets = [0, 32], sizes = [8, 32], strides = [1, 1]} : vector<8x96xf32> to vector<8x32xf32>
    %428 = vector.extract_strided_slice %425 {offsets = [0, 64], sizes = [8, 32], strides = [1, 1]} : vector<8x96xf32> to vector<8x32xf32>
    %429 = vector.extract_strided_slice %416 {offsets = [0, 96], sizes = [8, 32], strides = [1, 1]} : vector<8x128xf32> to vector<8x32xf32>
    %430 = math.tanh %429 : vector<8x32xf32>
    %431 = arith.mulf %427, %417 : vector<8x32xf32>
    %432 = arith.mulf %426, %430 : vector<8x32xf32>
    %433 = arith.addf %431, %432 : vector<8x32xf32>
    %434 = math.tanh %433 : vector<8x32xf32>
    %435 = arith.mulf %428, %434 : vector<8x32xf32>
    %436 = vector.extract_strided_slice %412 {offsets = [0, 128], sizes = [8, 128], strides = [1, 1]} : vector<8x256xf32> to vector<8x128xf32>
    %437 = arith.addf %436, %16 : vector<8x128xf32>
    %438 = arith.truncf %435 : vector<8x32xf32> to vector<8x32xbf16>
    %c0_220 = arith.constant 0 : index
    %c0_221 = arith.constant 0 : index
    %439 = vector.load %arg6[%c0_220, %c0_221] : memref<32x128xbf16, #tpu.memory_space<vmem>>, vector<32x128xbf16>
    %cst_222 = arith.constant dense<0.000000e+00> : vector<8x128xf32>
    %440 = tpu.matmul %438, %439, %cst_222 {dimension_numbers = #tpu.dot_dimension_numbers<[1], [0], [0], [1], [0, 0, 1, 1], [], []>} : vector<8x32xbf16>, vector<32x128xbf16>, vector<8x128xf32> -> vector<8x128xf32>
    %441 = arith.addf %437, %440 : vector<8x128xf32>
    %c0_223 = arith.constant 0 : index
    %c0_224 = arith.constant 0 : index
    %442 = vector.load %arg16[%c0_223, %c0_224] : memref<8x32xf32, #tpu.memory_space<vmem>>, vector<8x32xf32>
    %443 = vector.extract_strided_slice %441 {offsets = [0, 0], sizes = [8, 96], strides = [1, 1]} : vector<8x128xf32> to vector<8x96xf32>
    %cst_225 = arith.constant 5.000000e-01 : f32
    %444 = vector.broadcast %cst_225 : f32 to vector<8x96xf32>
    %445 = arith.mulf %444, %443 : vector<8x96xf32>
    %446 = math.tanh %445 : vector<8x96xf32>
    %cst_226 = arith.constant 5.000000e-01 : f32
    %447 = vector.broadcast %cst_226 : f32 to vector<8x96xf32>
    %448 = arith.mulf %447, %446 : vector<8x96xf32>
    %cst_227 = arith.constant 5.000000e-01 : f32
    %449 = vector.broadcast %cst_227 : f32 to vector<8x96xf32>
    %450 = arith.addf %448, %449 : vector<8x96xf32>
    %451 = vector.extract_strided_slice %450 {offsets = [0, 0], sizes = [8, 32], strides = [1, 1]} : vector<8x96xf32> to vector<8x32xf32>
    %452 = vector.extract_strided_slice %450 {offsets = [0, 32], sizes = [8, 32], strides = [1, 1]} : vector<8x96xf32> to vector<8x32xf32>
    %453 = vector.extract_strided_slice %450 {offsets = [0, 64], sizes = [8, 32], strides = [1, 1]} : vector<8x96xf32> to vector<8x32xf32>
    %454 = vector.extract_strided_slice %441 {offsets = [0, 96], sizes = [8, 32], strides = [1, 1]} : vector<8x128xf32> to vector<8x32xf32>
    %455 = math.tanh %454 : vector<8x32xf32>
    %456 = arith.mulf %452, %442 : vector<8x32xf32>
    %457 = arith.mulf %451, %455 : vector<8x32xf32>
    %458 = arith.addf %456, %457 : vector<8x32xf32>
    %459 = math.tanh %458 : vector<8x32xf32>
    %460 = arith.mulf %453, %459 : vector<8x32xf32>
    %c0_228 = arith.constant 0 : index
    %c0_229 = arith.constant 0 : index
    %461 = vector.load %arg15[%c0_228, %c0_229] : memref<8x32xf32, #tpu.memory_space<vmem>>, vector<8x32xf32>
    tpu.vector_store %arg15[%c0_228, %c0_229], %433 {strides = array<i32>} : memref<8x32xf32, #tpu.memory_space<vmem>>, vector<8x32xf32>,
    %c0_230 = arith.constant 0 : index
    %c0_231 = arith.constant 0 : index
    %462 = vector.load %arg16[%c0_230, %c0_231] : memref<8x32xf32, #tpu.memory_space<vmem>>, vector<8x32xf32>
    tpu.vector_store %arg16[%c0_230, %c0_231], %458 {strides = array<i32>} : memref<8x32xf32, #tpu.memory_space<vmem>>, vector<8x32xf32>,
    %c0_232 = arith.constant 0 : index
    %c0_233 = arith.constant 0 : index
    %463 = vector.load %arg14[%c0_232, %c0_233] : memref<8x64xf32, #tpu.memory_space<vmem>>, vector<8x32xf32>
    tpu.vector_store %arg14[%c0_232, %c0_233], %435 {strides = array<i32>} : memref<8x64xf32, #tpu.memory_space<vmem>>, vector<8x32xf32>,
    %c0_234 = arith.constant 0 : index
    %c32_235 = arith.constant 32 : index
    %464 = vector.load %arg14[%c0_234, %c32_235] : memref<8x64xf32, #tpu.memory_space<vmem>>, vector<8x32xf32>
    tpu.vector_store %arg14[%c0_234, %c32_235], %460 {strides = array<i32>} : memref<8x64xf32, #tpu.memory_space<vmem>>, vector<8x32xf32>,
    %c0_i32_236 = arith.constant 0 : i32
    %465 = arith.cmpi eq, %arg1, %c0_i32_236 : i32
    %466 = arith.extui %465 : i1 to i32
    %c0_i32_237 = arith.constant 0 : i32
    %467 = arith.cmpi ne, %466, %c0_i32_237 : i32
    scf.if %467 {
      %c0_238 = arith.constant 0 : index
      %c32_239 = arith.constant 32 : index
      %468 = vector.load %arg14[%c0_238, %c32_239] : memref<8x64xf32, #tpu.memory_space<vmem>>, vector<8x32xf32>
      %469 = arith.truncf %468 : vector<8x32xf32> to vector<8x32xbf16>
      %c0_240 = arith.constant 0 : index
      %c0_241 = arith.constant 0 : index
      %470 = vector.load %arg8[%c0_240, %c0_241] : memref<32x256xbf16, #tpu.memory_space<vmem>>, vector<32x256xbf16>
      %cst_242 = arith.constant dense<0.000000e+00> : vector<8x256xf32>
      %471 = tpu.matmul %469, %470, %cst_242 {dimension_numbers = #tpu.dot_dimension_numbers<[1], [0], [0], [1], [0, 0, 1, 1], [], []>} : vector<8x32xbf16>, vector<32x256xbf16>, vector<8x256xf32> -> vector<8x256xf32>
      %c0_243 = arith.constant 0 : index
      %c0_244 = arith.constant 0 : index
      %472 = vector.load %arg9[%c0_243, %c0_244] : memref<1x256xf32, #tpu.memory_space<vmem>>, vector<1x256xf32>
      %473 = vector.broadcast %472 : vector<1x256xf32> to vector<8x256xf32>
      %474 = arith.addf %471, %473 : vector<8x256xf32>
      %cst_245 = arith.constant 0.000000e+00 : f32
      %475 = vector.broadcast %cst_245 : f32 to vector<8x256xf32>
      %476 = arith.maximumf %474, %475 : vector<8x256xf32>
      %477 = arith.truncf %476 : vector<8x256xf32> to vector<8x256xbf16>
      %c0_246 = arith.constant 0 : index
      %c0_247 = arith.constant 0 : index
      %478 = vector.load %arg10[%c0_246, %c0_247] : memref<256x128xbf16, #tpu.memory_space<vmem>>, vector<256x128xbf16>
      %cst_248 = arith.constant dense<0.000000e+00> : vector<8x128xf32>
      %479 = tpu.matmul %477, %478, %cst_248 {dimension_numbers = #tpu.dot_dimension_numbers<[1], [0], [0], [1], [0, 0, 1, 1], [], []>} : vector<8x256xbf16>, vector<256x128xbf16>, vector<8x128xf32> -> vector<8x128xf32>
      %c0_249 = arith.constant 0 : index
      %c0_250 = arith.constant 0 : index
      %480 = vector.load %arg11[%c0_249, %c0_250] : memref<1x128xf32, #tpu.memory_space<vmem>>, vector<1x128xf32>
      %481 = vector.broadcast %480 : vector<1x128xf32> to vector<8x128xf32>
      %482 = arith.addf %479, %481 : vector<8x128xf32>
      %cst_251 = arith.constant 0.000000e+00 : f32
      %483 = vector.broadcast %cst_251 : f32 to vector<8x128xf32>
      %484 = arith.maximumf %482, %483 : vector<8x128xf32>
      %c0_252 = arith.constant 0 : index
      %c0_253 = arith.constant 0 : index
      %485 = vector.load %arg12[%c0_252, %c0_253] : memref<8x128xf32, #tpu.memory_space<vmem>>, vector<8x128xf32>
      tpu.vector_store %arg12[%c0_252, %c0_253], %484 {strides = array<i32>} : memref<8x128xf32, #tpu.memory_space<vmem>>, vector<8x128xf32>,
    } else {
    }
    return
  }
  func.func @transform_0(%arg0: i32, %arg1: i32) -> (i32, i32, i32) {
    %c0_i32 = arith.constant 0 : i32
    %c0_i32_0 = arith.constant 0 : i32
    return %arg1, %arg0, %c0_i32 : i32, i32, i32
  }
  func.func @transform_1(%arg0: i32, %arg1: i32) -> (i32, i32) {
    %c0_i32 = arith.constant 0 : i32
    %c0_i32_0 = arith.constant 0 : i32
    %c0_i32_1 = arith.constant 0 : i32
    return %c0_i32, %c0_i32_0 : i32, i32
  }
  func.func @transform_2(%arg0: i32, %arg1: i32) -> (i32, i32) {
    %c0_i32 = arith.constant 0 : i32
    %c0_i32_0 = arith.constant 0 : i32
    %c0_i32_1 = arith.constant 0 : i32
    return %c0_i32, %c0_i32_0 : i32, i32
  }
  func.func @transform_3(%arg0: i32, %arg1: i32) -> (i32, i32) {
    %c0_i32 = arith.constant 0 : i32
    %c0_i32_0 = arith.constant 0 : i32
    %c0_i32_1 = arith.constant 0 : i32
    return %c0_i32, %c0_i32_0 : i32, i32
  }
  func.func @transform_4(%arg0: i32, %arg1: i32) -> (i32, i32) {
    %c0_i32 = arith.constant 0 : i32
    %c0_i32_0 = arith.constant 0 : i32
    %c0_i32_1 = arith.constant 0 : i32
    return %c0_i32, %c0_i32_0 : i32, i32
  }
  func.func @transform_5(%arg0: i32, %arg1: i32) -> (i32, i32) {
    %c0_i32 = arith.constant 0 : i32
    %c0_i32_0 = arith.constant 0 : i32
    %c0_i32_1 = arith.constant 0 : i32
    return %c0_i32, %c0_i32_0 : i32, i32
  }
  func.func @transform_6(%arg0: i32, %arg1: i32) -> (i32, i32) {
    %c0_i32 = arith.constant 0 : i32
    %c0_i32_0 = arith.constant 0 : i32
    %c0_i32_1 = arith.constant 0 : i32
    return %c0_i32, %c0_i32_0 : i32, i32
  }
  func.func @transform_7(%arg0: i32, %arg1: i32) -> (i32, i32) {
    %c0_i32 = arith.constant 0 : i32
    %c0_i32_0 = arith.constant 0 : i32
    %c0_i32_1 = arith.constant 0 : i32
    return %c0_i32, %c0_i32_0 : i32, i32
  }
  func.func @transform_8(%arg0: i32, %arg1: i32) -> (i32, i32) {
    %c0_i32 = arith.constant 0 : i32
    %c0_i32_0 = arith.constant 0 : i32
    %c0_i32_1 = arith.constant 0 : i32
    return %c0_i32, %c0_i32_0 : i32, i32
  }
  func.func @transform_9(%arg0: i32, %arg1: i32) -> (i32, i32) {
    %c0_i32 = arith.constant 0 : i32
    %c0_i32_0 = arith.constant 0 : i32
    %c0_i32_1 = arith.constant 0 : i32
    return %c0_i32, %c0_i32_0 : i32, i32
  }
  func.func @transform_10(%arg0: i32, %arg1: i32) -> (i32, i32) {
    %c0_i32 = arith.constant 0 : i32
    %c0_i32_0 = arith.constant 0 : i32
    return %arg0, %c0_i32 : i32, i32
  }
}

</mosaic_0001>

<bundles_post_ra>
// kernel: lstm_model_forward.1
= control target key start
LH: loop header
LB: loop body
LE: loop exit
PB: predicated region body
PF: predicated region fallthrough
CT: control target
= control target key end

     0   :  { %15 = vsyncpa [#allocation7], 0  ;;  %s3403_s0 = inlined_call_operand.vmem [shape: f32[8,8,16], index: 0, kind: input, shape index: {}]   ;;  %s3404_s1 = inlined_call_operand.vmem [shape: bf16[16,128], index: 1, kind: input, shape index: {}]   ;;  %s3405_s2 = inlined_call_operand.vmem [shape: f32[1,128], index: 2, kind: input, shape index: {}]   ;;  %s3406_s3 = inlined_call_operand.hbm [shape: bf16[64,256], index: 3, kind: input, shape index: {}]   ;;  %s3407_s4 = inlined_call_operand.hbm [shape: bf16[32,128], index: 4, kind: input, shape index: {}]   ;;  %s3408_s5 = inlined_call_operand.vmem [shape: f32[1,128], index: 5, kind: input, shape index: {}]   ;;  %s3409_s6 = inlined_call_operand.hbm [shape: bf16[32,256], index: 6, kind: input, shape index: {}]   ;;  %s3410_s7 = inlined_call_operand.vmem [shape: f32[1,256], index: 7, kind: input, shape index: {}]   ;;  %s3411_s8 = inlined_call_operand.vmem [shape: bf16[256,128], index: 8, kind: input, shape index: {}]   ;;  %s3412_s9 = inlined_call_operand.vmem [shape: f32[1,128], index: 9, kind: input, shape index: {}]   ;;  %s3413_s10 = inlined_call_operand.vmem [shape: f32[8,128], index: 10, kind: output, shape index: {}]  }
   0x1   :  { %16 = vsyncpa [#allocation9], 0  ;;  %s2871_s13 = smov [#allocation8]   ;;  %s2801_s17 = scalar_lea.hbm %s3407_s4, 256 }
   0x2   :  { %s40_s14 = sshll.u32 %s2871_s13, 4  ;;  %p2802_p0 = scmp.ne.s32.totalorder %s3407_s4, %s2801_s17  ;;  %s41_s14 = int_to_ptr.vmem [resolvable:$true] %s40_s14 }
   0x3   :  { %p2805_p1 = scmp.lt.u32.totalorder %s2801_s17, %s3407_s4 }
   0x5   :  { %p2807_p2 = pnand %p2805_p1, %p2802_p0 }
   0x7   :  { %2810 = shalt.err (!%p2807_p2)
}
   0x8   :  { %s2811_s22 = scalar_lea.vmem %s41_s14, 256  ;;  %p2816_p4 = scmp.lt.s32.totalorder %s41_s14, %s41_s14 }
   0x9   :  { %p2812_p3 = scmp.ne.s32.totalorder %s41_s14, %s2811_s22  ;;  %p2817_p5 = scmp.lt.s32.totalorder %s2811_s22, %s2811_s22 }
   0xb   :  { %p2818_p6 = por %p2817_p5, %p2816_p4 }
   0xd   :  { %p2819_p7 = pnand %p2818_p6, %p2812_p3 }
   0xf   :  { %2822 = shalt.err (!%p2819_p7)
}
  0x10   :  { %s2872_s23 = smov 64   ;;  %s2873_s24 = smov 4  }
  0x11   :  { %46 = dma.hbm_to_vmem [thread:$0]  %s3407_s4, 256, %s41_s14, [#allocation9], %s2872_s23, %s2872_s23, %s2873_s24  }
  0x12   :  { %s2874_s27 = smov [#allocation6]   ;;  %s2823_s11 = scalar_lea.hbm %s3406_s3, 1024 }
  0x13   :  { %s28_s28 = sshll.u32 %s2874_s27, 4  ;;  %p2824_p8 = scmp.ne.s32.totalorder %s3406_s3, %s2823_s11  ;;  %s29_s28 = int_to_ptr.vmem [resolvable:$true] %s28_s28 }
  0x14   :  { %p2827_p9 = scmp.lt.u32.totalorder %s2823_s11, %s3406_s3 }
  0x16   :  { %p2829_p10 = pnand %p2827_p9, %p2824_p8 }
  0x18   :  { %2832 = shalt.err (!%p2829_p10)
}
  0x19   :  { %s2833_s17 = scalar_lea.vmem %s29_s28, 1024  ;;  %p2838_p12 = scmp.lt.s32.totalorder %s29_s28, %s29_s28 }
  0x1a   :  { %p2834_p11 = scmp.ne.s32.totalorder %s29_s28, %s2833_s17  ;;  %p2839_p13 = scmp.lt.s32.totalorder %s2833_s17, %s2833_s17 }
  0x1c   :  { %p2840_p0 = por %p2839_p13, %p2838_p12 }
  0x1e   :  { %p2841_p1 = pnand %p2840_p0, %p2834_p11 }
  0x20   :  { %2844 = shalt.err (!%p2841_p1)
}
  0x21   :  { %s2875_s4 = smov 128   ;;  %s2876_s14 = smov 8  }
  0x22   :  { %34 = dma.hbm_to_vmem [thread:$0]  %s3406_s3, 1024, %s29_s28, [#allocation7], %s2875_s4, %s2875_s4, %s2876_s14  }
  0x23   :  { %s2877_s20 = smov [#allocation10]   ;;  %s2845_s25 = scalar_lea.hbm %s3409_s6, 512 }
  0x24   :  { %s54_s21 = sshll.u32 %s2877_s20, 4  ;;  %p2846_p2 = scmp.ne.s32.totalorder %s3409_s6, %s2845_s25  ;;  %s55_s21 = int_to_ptr.vmem [resolvable:$true] %s54_s21 }
  0x25   :  { %p2849_p3 = scmp.lt.u32.totalorder %s2845_s25, %s3409_s6 }
  0x27   :  { %p2851_p4 = pnand %p2849_p3, %p2846_p2 }
  0x29   :  { %2854 = shalt.err (!%p2851_p4)
}
  0x2a   :  { %s2855_s11 = scalar_lea.vmem %s55_s21, 512  ;;  %p2860_p6 = scmp.lt.s32.totalorder %s55_s21, %s55_s21 }
  0x2b   :  { %p2856_p5 = scmp.ne.s32.totalorder %s55_s21, %s2855_s11  ;;  %p2861_p7 = scmp.lt.s32.totalorder %s2855_s11, %s2855_s11 }
  0x2d   :  { %p2862_p8 = por %p2861_p7, %p2860_p6 }
  0x2f   :  { %p2863_p9 = pnand %p2862_p8, %p2856_p5 }
  0x31   :  { %2866 = shalt.err (!%p2863_p9)
}
  0x32   :  { %60 = dma.hbm_to_vmem [thread:$0]  %s3409_s6, 512, %s55_s21, [#allocation9], %s2875_s4, %s2875_s4, %s2876_s14  }
  0x33   :  { %2867 = dma.done.wait [#allocation7], 1024  }
  0x34   :  { %2868 = vsyncadd [#allocation7], 4294966272 }
  0x35   :  { %2869 = dma.done.wait [#allocation9], 768  }
  0x36   :  { %2870 = vsyncadd [#allocation9], 4294966528  ;;  %vm81_vm0 = vcmask 523264   ;;  %v2878_v0 = vmov 0.0   ;;  %v2879_v1 = vmov 0   ;;  %v2641_v2 = vld [vmem:[%s3404_s1] sm:$0xff]  }
  0x37   :  { %82 = vst.msk [vmem:[#allocation3] sm:$0xff] %vm81_vm0, %v2878_v0  ;;  %537 = vmatprep.mubr.bf16.mxu1 %v2879_v1  ;;  %v86_v3 = vld [vmem:[%s3403_s0] sm:$0xff]  ;;  %v87_v4 = vld [vmem:[%s3403_s0 + $0x8] sm:$0xff]  ;;  %vm106_vm1 = vcmask 130048   ;;  %v88_v5 = vld [vmem:[%s3403_s0 + $0x10] sm:$0xff]  ;;  %2555 = vmatprep.subr.bf16.mxu0 %v2641_v2  ;;  %vm83_vm2 = vcmask 261120  }
  0x38   :  { %v94_v6 = vpack.c.bf16 %v87_v4, %v86_v3  ;;  %v89_v7 = vld [vmem:[%s3403_s0 + $0x18] sm:$0xff]  ;;  %2556 = vmatpush3.bf16.msra.mxu0 %v2641_v2  ;;  %v2999_v11 = vld [vmem:[#allocation6 + $0x14] ss:$8 sps:$4 sm:$0xff]   ;;  %v90_v12 = vld [vmem:[%s3403_s0 + $0x20] sm:$0xff]  ;;  %84 = vst.msk [vmem:[#allocation4] sm:$0xff] %vm83_vm2, %v2878_v0  ;;  %vm2881_vm3 = vmmov 0  }
  0x39   :  { %v95_v8 = vpack.c.bf16 %v89_v7, %v88_v5  ;;  %v2994_v9 = vld [vmem:[#allocation6] ss:$8 sps:$4 sm:$0xff]   ;;  %v2996_v10 = vld [vmem:[#allocation6 + $0x4] ss:$8 sps:$4 sm:$0xff]   ;;  %v91_v13 = vld [vmem:[%s3403_s0 + $0x28] sm:$0xff]  ;;  %85 = vst.msk [vmem:[#allocation5] sm:$0xff] %vm83_vm2, %v2878_v0 }
  0x3a   :  { %2557 = vmatprep.mubr.msk.bf16.mxu0 %vm106_vm1, %v94_v6  ;;  %268 = vmatprep.subr.bf16.mxu0 %v2996_v10  ;;  %v3010_v14 = vld [vmem:[#allocation6 + $0x10] ss:$8 sps:$4 sm:$0xff]   ;;  %v96_v15 = vpack.c.bf16 %v91_v13, %v90_v12  ;;  %v93_v17 = vld [vmem:[%s3403_s0 + $0x38] sm:$0xff]  ;;  %v3027_v21 = vld [vmem:[#allocation6 + $0x34] ss:$8 sps:$4 sm:$0xff]   ;;  %s2882_s3 = smov 96  }
  0x3b   :  { %505 = vmatprep.subr.bf16.mxu1 %v2996_v10  ;;  %2558 = vmatmul.mubr.msk.bf16.vlgmr.msra.gmra.mrb[0].mxu0 %vm106_vm1, %v95_v8  ;;  %v92_v16 = vld [vmem:[%s3403_s0 + $0x30] sm:$0xff]  ;;  %v3023_v18 = vld [vmem:[#allocation6 + $0x24] ss:$8 sps:$4 sm:$0xff]   ;;  %v3025_v19 = vld [vmem:[#allocation6 + $0x20] ss:$8 sps:$4 sm:$0xff]   ;;  %vm450_vm4 = vcmask 523520  }
  0x3c   :  { %506 = vmatpush1.bf16.msra.mxu1 %v2994_v9  ;;  %269 = vmatpush1.bf16.msra.mxu0 %v2994_v9  ;;  %v97_v20 = vpack.c.bf16 %v93_v17, %v92_v16  ;;  %v3033_v22 = vld [vmem:[#allocation6 + $0x30] ss:$8 sps:$4 sm:$0xff]   ;;  %v2384_v25 = vld [vmem:[%s3405_s2] ss:$0 sm:$0xff]  ;;  %s2880_s2 = smov 32   ;;  %v2654_v59 = vld [vmem:[#allocation8] sm:$0xff]  }
  0x3d   :  { %507 = vmatprep.subr.bf16.mxu1 %v2999_v11  ;;  %270 = vmatprep.subr.bf16.mxu0 %v2999_v11  ;;  %v2655_v60 = vld [vmem:[#allocation8 + $0x8] sm:$0xff]  }
  0x3e   :  { %2561 = vmatprep.mubr.msk.bf16.mxu0 %vm106_vm1, %v96_v15  ;;  %v214_v23 = vld [vmem:[#allocation3] sm:$0xff] }
  0x3f   :  { %v215_v24 = vpack.c.bf16 %v214_v23, %v214_v23  ;;  %v311_v48 = vld [vmem:[#allocation4] sm:$0xff]  ;;  %v3083_v5 = vld [vmem:[%s3408_s5] ss:$0 sm:$0xff] }
  0x40   :  { %508 = vmatpush1.bf16.msra.mxu1 %v3010_v14  ;;  %271 = vmatpush1.bf16.msra.mxu0 %v3010_v14  ;;  %v404_v3 = vld [vmem:[#allocation5] sm:$0xff] }
  0x41   :  { %509 = vmatprep.subr.bf16.mxu1 %v3023_v18  ;;  %272 = vmatprep.subr.bf16.mxu0 %v3023_v18 }
  0x43   :  { %2562 = vmatmul.mubr.msk.bf16.gmra.mrb[4].mxu0 %vm106_vm1, %v97_v20 }
  0x44   :  { %510 = vmatpush1.bf16.msra.mxu1 %v3025_v19  ;;  %273 = vmatpush1.bf16.msra.mxu0 %v3025_v19 }
  0x45   :  { %300 = vmatprep.mubr.bf16.mxu0 %v2879_v1  ;;  %274 = vmatprep.subr.bf16.mxu0 %v3027_v21 }
  0x46   :  { %511 = vmatprep.subr.bf16.mxu1 %v3027_v21 }
  0x48   :  { %512 = vmatpush1.bf16.msra.mxu1 %v3033_v22  ;;  %275 = vmatpush1.bf16.msra.mxu0 %v3033_v22 }
  0x49   :  { %2581 = vmatprep.subr.bf16.mxu1 %v2878_v0  ;;  %2565 = vmatprep.subr.bf16.mxu0 %v2878_v0 }
  0x4b   :  { %2394 = vmatmul.mubr.msk.bf16.vlgmr.msra.gmra.mrb[8].mxu0 %vm81_vm0, %v215_v24 }
  0x4c   :  { %2569 = vmatprep.mubr.msk.bf16.mxu0 %vm2881_vm3, %v2878_v0  ;;  %2566 = vmatpush3.bf16.msra.mxu0 %v2654_v59 }
  0x4d   :  { %2567 = vmatprep.subr.bf16.mxu0 %v2878_v0 }
  0x50   :  { %2568 = vmatpush3.bf16.msra.mxu0 %v2655_v60 }
  0x51   :  { %2573 = vmatprep.subr.bf16.mxu0 %v2878_v0 }
 0x10e   :  { %v2559_v26 = vpop.f32.mrb[0].mxu0 }
 0x10f   :  { %v3053_v27 = vadd.f32 %v2559_v26, %v2384_v25  ;;  %v153_v28 = vpop.f32.mrb[1].mxu0 }
 0x110   :  { %v2560_v29 = vpop.f32.mrb[2].mxu0  ;;  %v191_v41 = vadd.f32 %v2384_v25, %v153_v28 }
 0x111   :  { %v3055_v30 = vadd.f32 %v2560_v29, %v2384_v25  ;;  %v156_v31 = vpop.f32.mrb[3].mxu0 }
 0x112   :  { %v3057_v32 = vadd.f32 %v2384_v25, %v156_v31 }
 0x116   :  { %v2563_v33 = vpop.f32.mrb[4].mxu0 }
 0x117   :  { %v3059_v34 = vadd.f32 %v2563_v33, %v2384_v25  ;;  %v169_v35 = vpop.f32.mrb[5].mxu0 }
 0x118   :  { %v3061_v36 = vadd.f32 %v2384_v25, %v169_v35  ;;  %v2564_v37 = vpop.f32.mrb[6].mxu0 }
 0x119   :  { %v3063_v38 = vadd.f32 %v2564_v37, %v2384_v25  ;;  %v172_v39 = vpop.f32.mrb[7].mxu0 }
 0x11a   :  { %v3065_v40 = vadd.f32 %v2384_v25, %v172_v39 }
 0x11e   :  { %v302_v42 = vpop.f32.mrb[8].mxu0 }
 0x11f   :  { %v310_v43 = vadd.f32 %v302_v42, %v191_v41  ;;  %v304_v44 = vpop.f32.mrb[9].mxu0 }
 0x120   :  { %v306_v45 = vpop.f32.mrb[10].mxu0  ;;  %v338_v6 = vadd.f32 %v3083_v5, %v304_v44 }
 0x121   :  { %2704 = vtanh.f32 %v310_v43  ;;  %v307_v46 = vpop.f32.mrb[11].mxu0  ;;  %v312_v49 = vmul.f32 0.5, %v310_v43 }
 0x123   :  { %2706 = vtanh.f32 %v312_v49 }
 0x12b   :  { %v2705_v47 = vpop.eup %2704 }
 0x12c   :  { %323 = vrot.lane.b32.xlu0 %v2705_v47, %s2880_s2 }
 0x12d   :  { %v2707_v50 = vpop.eup %2706 }
 0x12e   :  { %v314_v51 = vmul.f32 0.5, %v2707_v50 }
 0x130   :  { %318 = vrot.lane.b32.xlu0 %v311_v48, %s2880_s2  ;;  %v315_v52 = vadd.f32 0.5, %v314_v51 }
 0x19e   :  { %v324_v53 = vpop.permute.xlu0 %323 }
 0x19f   :  { %v326_v54 = vmul.f32 %v324_v53, %v315_v52 }
 0x1a1   :  { %328 = vrot.lane.b32.xlu1 %v326_v54, %s2880_s2 }
 0x1a2   :  { %v319_v55 = vpop.permute.xlu0 %318 }
 0x1a3   :  { %v321_v56 = vmul.f32 %v319_v55, %v315_v52 }
 0x213   :  { %v329_v57 = vpop.permute.xlu1 %328 }
 0x214   :  { %v331_v58 = vadd.f32 %v329_v57, %v321_v56 }
 0x216   :  { %2708 = vtanh.f32 %v331_v58 }
 0x220   :  { %v2709_v61 = vpop.eup %2708 }
 0x221   :  { %334 = vrot.lane.b32.xlu1 %v2709_v61, %s2880_s2 }
 0x293   :  { %v335_v62 = vpop.permute.xlu1 %334 }
 0x294   :  { %v337_v63 = vmul.f32 %v335_v62, %v315_v52 }
 0x296   :  { %v339_v2 = vpack.c.bf16 %v337_v63, %v337_v63 }
 0x298   :  { %345 = vrot.lane.b32.xlu0 %v339_v2, %s2872_s23  ;;  %v2657_v2 = vld [vmem:[#allocation8 + $0x8] sm:$0xff]  }
 0x29c   :  { %411 = vrot.lane.b32.xlu0 %v404_v3, %s2880_s2 }
 0x30a   :  { %v346_v4 = vpop.permute.xlu0 %345 }
 0x30b   :  { %2570 = vmatmul.mubr.msk.bf16.vlgmr.msra.gmra.mrb[12].mxu0 %vm83_vm2, %v346_v4 }
 0x30c   :  { %2577 = vmatprep.mubr.msk.bf16.mxu0 %vm2881_vm3, %v2878_v0 }
 0x30e   :  { %v412_v28 = vpop.permute.xlu0 %411 }
 0x3de   :  { %v397_v7 = vpop.f32.mrb[12].mxu0 }
 0x3df   :  { %v403_v8 = vadd.f32 %v397_v7, %v338_v6  ;;  %v2571_v12 = vpop.f32.mrb[13].mxu0 }
 0x3e0   :  { %v400_v13 = vpop.f32.mrb[14].mxu0 }
 0x3e1   :  { %2710 = vtanh.f32 %v403_v8  ;;  %v2572_v15 = vpop.f32.mrb[15].mxu0  ;;  %v405_v17 = vmul.f32 0.5, %v403_v8 }
 0x3e3   :  { %2712 = vtanh.f32 %v405_v17 }
 0x3eb   :  { %v2711_v16 = vpop.eup %2710 }
 0x3ec   :  { %416 = vrot.lane.b32.xlu1 %v2711_v16, %s2880_s2 }
 0x3ed   :  { %v2713_v20 = vpop.eup %2712 }
 0x3ee   :  { %v407_v23 = vmul.f32 0.5, %v2713_v20 }
 0x3f0   :  { %v408_v24 = vadd.f32 0.5, %v407_v23 }
 0x3f2   :  { %v414_v29 = vmul.f32 %v412_v28, %v408_v24 }
 0x45e   :  { %v417_v25 = vpop.permute.xlu1 %416 }
 0x45f   :  { %v419_v26 = vmul.f32 %v417_v25, %v408_v24 }
 0x461   :  { %421 = vrot.lane.b32.xlu1 %v419_v26, %s2880_s2 }
 0x465   :  { %442 = vrot.lane.b32.xlu1 %v337_v63, %s2872_s23  ;;  %v2656_v63 = vld [vmem:[#allocation8] sm:$0xff]  }
 0x466   :  { %2574 = vmatpush3.bf16.msra.mxu0 %v2656_v63 }
 0x467   :  { %2575 = vmatprep.subr.bf16.mxu0 %v2878_v0 }
 0x469   :  { %432 = vrot.lane.b32.xlu1 %v331_v58, %s2882_s3 }
 0x46a   :  { %2576 = vmatpush3.bf16.msra.mxu0 %v2657_v2 }
 0x46b   :  { %741 = vmatprep.subr.bf16.mxu0 %v2996_v10 }
 0x4d3   :  { %v422_v31 = vpop.permute.xlu1 %421 }
 0x4d4   :  { %v424_v33 = vadd.f32 %v422_v31, %v414_v29 }
 0x4d6   :  { %2714 = vtanh.f32 %v424_v33 }
 0x4d7   :  { %v443_v35 = vpop.permute.xlu1 %442 }
 0x4d8   :  { %445 = vst.msk [vmem:[#allocation3] sm:$0xff] %vm83_vm2, %v443_v35 }
 0x4db   :  { %v433_v37 = vpop.permute.xlu1 %432 }
 0x4dc   :  { %435 = vst.msk [vmem:[#allocation4] sm:$0xff] %vm83_vm2, %v433_v37 }
 0x4e0   :  { %v2715_v39 = vpop.eup %2714 }
 0x4e1   :  { %427 = vrot.lane.b32.xlu0 %v2715_v39, %s2880_s2 }
 0x4e3   :  { %v549_v41 = vld [vmem:[#allocation4] sm:$0xff] }
 0x4e4   :  { %556 = vrot.lane.b32.xlu1 %v549_v41, %s2880_s2 }
 0x553   :  { %v428_v42 = vpop.permute.xlu0 %427 }
 0x554   :  { %v430_v43 = vmul.f32 %v428_v42, %v408_v24 }
 0x556   :  { %447 = vrot.lane.b32.xlu0 %v430_v43, %s2882_s3  ;;  %v557_v59 = vpop.permute.xlu1 %556 }
 0x5c8   :  { %v448_v44 = vpop.permute.xlu0 %447 }
 0x5c9   :  { %451 = vst.msk [vmem:[#allocation3] sm:$0xff] %vm450_vm4, %v448_v44 }
 0x5d0   :  { %v452_v45 = vld [vmem:[#allocation3] sm:$0xff] }
 0x5d1   :  { %v453_v46 = vpack.c.bf16 %v452_v45, %v452_v45 }
 0x5d3   :  { %2406 = vmatmul.mubr.msk.bf16.vlgmr.msra.gmra.mrb[0].mxu1 %vm81_vm0, %v453_v46 }
 0x5d4   :  { %2585 = vmatprep.mubr.msk.bf16.mxu1 %vm2881_vm3, %v2878_v0 }
 0x6a6   :  { %v539_v47 = vpop.f32.mrb[0].mxu1 }
 0x6a7   :  { %v548_v48 = vadd.f32 %v539_v47, %v3057_v32  ;;  %v541_v49 = vpop.f32.mrb[1].mxu1 }
 0x6a8   :  { %v543_v50 = vpop.f32.mrb[2].mxu1  ;;  %v576_v13 = vadd.f32 %v3083_v5, %v541_v49 }
 0x6a9   :  { %2716 = vtanh.f32 %v548_v48  ;;  %v544_v51 = vpop.f32.mrb[3].mxu1  ;;  %v550_v53 = vmul.f32 0.5, %v548_v48 }
 0x6ab   :  { %2718 = vtanh.f32 %v550_v53 }
 0x6b3   :  { %v2717_v52 = vpop.eup %2716 }
 0x6b4   :  { %561 = vrot.lane.b32.xlu0 %v2717_v52, %s2880_s2 }
 0x6b5   :  { %v2719_v54 = vpop.eup %2718 }
 0x6b6   :  { %v552_v55 = vmul.f32 0.5, %v2719_v54 }
 0x6b8   :  { %v553_v56 = vadd.f32 0.5, %v552_v55 }
 0x6ba   :  { %v559_v60 = vmul.f32 %v557_v59, %v553_v56 }
 0x726   :  { %v562_v57 = vpop.permute.xlu0 %561 }
 0x727   :  { %v564_v58 = vmul.f32 %v562_v57, %v553_v56 }
 0x729   :  { %566 = vrot.lane.b32.xlu0 %v564_v58, %s2880_s2 }
 0x79b   :  { %v567_v61 = vpop.permute.xlu0 %566 }
 0x79c   :  { %v569_v32 = vadd.f32 %v567_v61, %v559_v60 }
 0x79e   :  { %2720 = vtanh.f32 %v569_v32 }
 0x7a8   :  { %v2721_v62 = vpop.eup %2720 }
 0x7a9   :  { %572 = vrot.lane.b32.xlu1 %v2721_v62, %s2880_s2 }
 0x7ad   :  { %437 = vrot.lane.b32.xlu1 %v424_v33, %s2882_s3 }
 0x81b   :  { %v573_v3 = vpop.permute.xlu1 %572 }
 0x81c   :  { %v575_v4 = vmul.f32 %v573_v3, %v553_v56 }
 0x81e   :  { %v577_v6 = vpack.c.bf16 %v575_v4, %v575_v4 }
 0x81f   :  { %v438_v7 = vpop.permute.xlu1 %437 }
 0x820   :  { %440 = vst.msk [vmem:[#allocation5] sm:$0xff] %vm83_vm2, %v438_v7  ;;  %583 = vrot.lane.b32.xlu0 %v577_v6, %s2872_s23  ;;  %v2659_v6 = vld [vmem:[#allocation8 + $0x8] sm:$0xff]  }
 0x827   :  { %v641_v8 = vld [vmem:[#allocation5] sm:$0xff] }
 0x828   :  { %648 = vrot.lane.b32.xlu1 %v641_v8, %s2880_s2 }
 0x892   :  { %v584_v12 = vpop.permute.xlu0 %583 }
 0x893   :  { %2578 = vmatmul.mubr.msk.bf16.vlgmr.msra.gmra.mrb[16].mxu0 %vm83_vm2, %v584_v12 }
 0x894   :  { %742 = vmatpush1.bf16.msra.mxu0 %v2994_v9  ;;  %773 = vmatprep.mubr.bf16.mxu0 %v2879_v1 }
 0x895   :  { %743 = vmatprep.subr.bf16.mxu0 %v2999_v11 }
 0x898   :  { %744 = vmatpush1.bf16.msra.mxu0 %v3010_v14 }
 0x899   :  { %745 = vmatprep.subr.bf16.mxu0 %v3023_v18 }
 0x89a   :  { %v649_v35 = vpop.permute.xlu1 %648 }
 0x89c   :  { %746 = vmatpush1.bf16.msra.mxu0 %v3025_v19 }
 0x89d   :  { %747 = vmatprep.subr.bf16.mxu0 %v3027_v21 }
 0x8a0   :  { %748 = vmatpush1.bf16.msra.mxu0 %v3033_v22 }
 0x8a1   :  { %2589 = vmatprep.subr.bf16.mxu0 %v2878_v0 }
 0x966   :  { %v634_v15 = vpop.f32.mrb[16].mxu0 }
 0x967   :  { %v640_v16 = vadd.f32 %v634_v15, %v576_v13  ;;  %v2579_v17 = vpop.f32.mrb[17].mxu0 }
 0x968   :  { %v637_v20 = vpop.f32.mrb[18].mxu0 }
 0x969   :  { %2722 = vtanh.f32 %v640_v16  ;;  %v2580_v23 = vpop.f32.mrb[19].mxu0  ;;  %v642_v25 = vmul.f32 0.5, %v640_v16 }
 0x96b   :  { %2724 = vtanh.f32 %v642_v25 }
 0x973   :  { %v2723_v24 = vpop.eup %2722 }
 0x974   :  { %653 = vrot.lane.b32.xlu0 %v2723_v24, %s2880_s2 }
 0x975   :  { %v2725_v26 = vpop.eup %2724 }
 0x976   :  { %v644_v28 = vmul.f32 0.5, %v2725_v26 }
 0x978   :  { %v645_v29 = vadd.f32 0.5, %v644_v28 }
 0x97a   :  { %v651_v37 = vmul.f32 %v649_v35, %v645_v29 }
 0x9e6   :  { %v654_v31 = vpop.permute.xlu0 %653 }
 0x9e7   :  { %v656_v33 = vmul.f32 %v654_v31, %v645_v29 }
 0x9e9   :  { %658 = vrot.lane.b32.xlu0 %v656_v33, %s2880_s2 }
 0x9ed   :  { %679 = vrot.lane.b32.xlu0 %v575_v4, %s2872_s23  ;;  %v2658_v4 = vld [vmem:[#allocation8] sm:$0xff]  }
 0x9ee   :  { %2582 = vmatpush3.bf16.msra.mxu1 %v2658_v4 }
 0x9ef   :  { %2583 = vmatprep.subr.bf16.mxu1 %v2878_v0 }
 0x9f1   :  { %669 = vrot.lane.b32.xlu0 %v569_v32, %s2882_s3 }
 0x9f2   :  { %2584 = vmatpush3.bf16.msra.mxu1 %v2659_v6 }
 0x9f3   :  { %977 = vmatprep.subr.bf16.mxu1 %v2996_v10 }
 0xa5b   :  { %v659_v39 = vpop.permute.xlu0 %658 }
 0xa5c   :  { %v661_v41 = vadd.f32 %v659_v39, %v651_v37 }
 0xa5e   :  { %2726 = vtanh.f32 %v661_v41 }
 0xa5f   :  { %v680_v42 = vpop.permute.xlu0 %679 }
 0xa60   :  { %682 = vst.msk [vmem:[#allocation3] sm:$0xff] %vm83_vm2, %v680_v42 }
 0xa63   :  { %v670_v43 = vpop.permute.xlu0 %669 }
 0xa64   :  { %672 = vst.msk [vmem:[#allocation4] sm:$0xff] %vm83_vm2, %v670_v43 }
 0xa68   :  { %v2727_v44 = vpop.eup %2726 }
 0xa69   :  { %664 = vrot.lane.b32.xlu1 %v2727_v44, %s2880_s2 }
 0xa6b   :  { %v785_v45 = vld [vmem:[#allocation4] sm:$0xff] }
 0xa6c   :  { %792 = vrot.lane.b32.xlu0 %v785_v45, %s2880_s2 }
 0xadb   :  { %v665_v46 = vpop.permute.xlu1 %664 }
 0xadc   :  { %v667_v47 = vmul.f32 %v665_v46, %v645_v29 }
 0xade   :  { %684 = vrot.lane.b32.xlu1 %v667_v47, %s2882_s3  ;;  %v793_v62 = vpop.permute.xlu0 %792 }
 0xb50   :  { %v685_v48 = vpop.permute.xlu1 %684 }
 0xb51   :  { %687 = vst.msk [vmem:[#allocation3] sm:$0xff] %vm450_vm4, %v685_v48 }
 0xb58   :  { %v688_v49 = vld [vmem:[#allocation3] sm:$0xff] }
 0xb59   :  { %v689_v50 = vpack.c.bf16 %v688_v49, %v688_v49 }
 0xb5b   :  { %2418 = vmatmul.mubr.msk.bf16.vlgmr.msra.gmra.mrb[20].mxu0 %vm81_vm0, %v689_v50 }
 0xb5c   :  { %2593 = vmatprep.mubr.msk.bf16.mxu0 %vm2881_vm3, %v2878_v0 }
 0xc2e   :  { %v775_v51 = vpop.f32.mrb[20].mxu0 }
 0xc2f   :  { %v784_v52 = vadd.f32 %v775_v51, %v3053_v27  ;;  %v777_v53 = vpop.f32.mrb[21].mxu0 }
 0xc30   :  { %v779_v54 = vpop.f32.mrb[22].mxu0  ;;  %v812_v17 = vadd.f32 %v3083_v5, %v777_v53 }
 0xc31   :  { %2728 = vtanh.f32 %v784_v52  ;;  %v780_v55 = vpop.f32.mrb[23].mxu0  ;;  %v786_v57 = vmul.f32 0.5, %v784_v52 }
 0xc33   :  { %2730 = vtanh.f32 %v786_v57 }
 0xc3b   :  { %v2729_v56 = vpop.eup %2728 }
 0xc3c   :  { %797 = vrot.lane.b32.xlu1 %v2729_v56, %s2880_s2 }
 0xc3d   :  { %v2731_v58 = vpop.eup %2730 }
 0xc3e   :  { %v788_v59 = vmul.f32 0.5, %v2731_v58 }
 0xc40   :  { %v789_v60 = vadd.f32 0.5, %v788_v59 }
 0xc42   :  { %v795_v63 = vmul.f32 %v793_v62, %v789_v60 }
 0xcae   :  { %v798_v61 = vpop.permute.xlu1 %797 }
 0xcaf   :  { %v800_v32 = vmul.f32 %v798_v61, %v789_v60 }
 0xcb1   :  { %802 = vrot.lane.b32.xlu1 %v800_v32, %s2880_s2 }
 0xd23   :  { %v803_v2 = vpop.permute.xlu1 %802 }
 0xd24   :  { %v805_v27 = vadd.f32 %v803_v2, %v795_v63 }
 0xd26   :  { %2732 = vtanh.f32 %v805_v27 }
 0xd30   :  { %v2733_v3 = vpop.eup %2732 }
 0xd31   :  { %808 = vrot.lane.b32.xlu0 %v2733_v3, %s2880_s2 }
 0xd35   :  { %674 = vrot.lane.b32.xlu0 %v661_v41, %s2882_s3 }
 0xda3   :  { %v809_v7 = vpop.permute.xlu0 %808 }
 0xda4   :  { %v811_v8 = vmul.f32 %v809_v7, %v789_v60  ;;  %v2660_v7 = vld [vmem:[#allocation8] sm:$0xff]  }
 0xda5   :  { %2590 = vmatpush3.bf16.msra.mxu0 %v2660_v7 }
 0xda6   :  { %v813_v12 = vpack.c.bf16 %v811_v8, %v811_v8  ;;  %2591 = vmatprep.subr.bf16.mxu0 %v2878_v0 }
 0xda7   :  { %v675_v13 = vpop.permute.xlu0 %674 }
 0xda8   :  { %677 = vst.msk [vmem:[#allocation5] sm:$0xff] %vm83_vm2, %v675_v13  ;;  %819 = vrot.lane.b32.xlu1 %v813_v12, %s2872_s23 }
 0xdaf   :  { %v877_v15 = vld [vmem:[#allocation5] sm:$0xff] }
 0xdb0   :  { %884 = vrot.lane.b32.xlu0 %v877_v15, %s2880_s2 }
 0xe1a   :  { %v820_v16 = vpop.permute.xlu1 %819 }
 0xe1b   :  { %2586 = vmatmul.mubr.msk.bf16.vlgmr.msra.gmra.mrb[4].mxu1 %vm83_vm2, %v820_v16 }
 0xe1c   :  { %978 = vmatpush1.bf16.msra.mxu1 %v2994_v9  ;;  %1009 = vmatprep.mubr.bf16.mxu1 %v2879_v1 }
 0xe1d   :  { %979 = vmatprep.subr.bf16.mxu1 %v2999_v11 }
 0xe20   :  { %980 = vmatpush1.bf16.msra.mxu1 %v3010_v14 }
 0xe21   :  { %981 = vmatprep.subr.bf16.mxu1 %v3023_v18 }
 0xe22   :  { %v885_v41 = vpop.permute.xlu0 %884 }
 0xe24   :  { %982 = vmatpush1.bf16.msra.mxu1 %v3025_v19 }
 0xe25   :  { %983 = vmatprep.subr.bf16.mxu1 %v3027_v21 }
 0xe28   :  { %984 = vmatpush1.bf16.msra.mxu1 %v3033_v22 }
 0xe29   :  { %2597 = vmatprep.subr.bf16.mxu1 %v2878_v0 }
 0xeee   :  { %v870_v20 = vpop.f32.mrb[4].mxu1 }
 0xeef   :  { %v876_v23 = vadd.f32 %v870_v20, %v812_v17  ;;  %v2587_v24 = vpop.f32.mrb[5].mxu1 }
 0xef0   :  { %v873_v25 = vpop.f32.mrb[6].mxu1 }
 0xef1   :  { %2734 = vtanh.f32 %v876_v23  ;;  %v2588_v26 = vpop.f32.mrb[7].mxu1  ;;  %v878_v29 = vmul.f32 0.5, %v876_v23 }
 0xef3   :  { %2736 = vtanh.f32 %v878_v29 }
 0xefb   :  { %v2735_v28 = vpop.eup %2734 }
 0xefc   :  { %889 = vrot.lane.b32.xlu1 %v2735_v28, %s2880_s2 }
 0xefd   :  { %v2737_v31 = vpop.eup %2736 }
 0xefe   :  { %v880_v33 = vmul.f32 0.5, %v2737_v31 }
 0xf00   :  { %v881_v35 = vadd.f32 0.5, %v880_v33 }
 0xf02   :  { %v887_v42 = vmul.f32 %v885_v41, %v881_v35 }
 0xf6e   :  { %v890_v37 = vpop.permute.xlu1 %889 }
 0xf6f   :  { %v892_v39 = vmul.f32 %v890_v37, %v881_v35 }
 0xf71   :  { %894 = vrot.lane.b32.xlu1 %v892_v39, %s2880_s2 }
 0xf75   :  { %915 = vrot.lane.b32.xlu1 %v811_v8, %s2872_s23  ;;  %v2661_v8 = vld [vmem:[#allocation8 + $0x8] sm:$0xff]  }
 0xf76   :  { %2592 = vmatpush3.bf16.msra.mxu0 %v2661_v8 }
 0xf77   :  { %1213 = vmatprep.subr.bf16.mxu0 %v2996_v10 }
 0xf79   :  { %905 = vrot.lane.b32.xlu1 %v805_v27, %s2882_s3 }
 0xfe3   :  { %v895_v43 = vpop.permute.xlu1 %894 }
 0xfe4   :  { %v897_v44 = vadd.f32 %v895_v43, %v887_v42 }
 0xfe6   :  { %2738 = vtanh.f32 %v897_v44 }
 0xfe7   :  { %v916_v45 = vpop.permute.xlu1 %915 }
 0xfe8   :  { %918 = vst.msk [vmem:[#allocation3] sm:$0xff] %vm83_vm2, %v916_v45 }
 0xfeb   :  { %v906_v46 = vpop.permute.xlu1 %905 }
 0xfec   :  { %908 = vst.msk [vmem:[#allocation4] sm:$0xff] %vm83_vm2, %v906_v46 }
 0xff0   :  { %v2739_v47 = vpop.eup %2738 }
 0xff1   :  { %900 = vrot.lane.b32.xlu0 %v2739_v47, %s2880_s2 }
 0xff3   :  { %v1021_v48 = vld [vmem:[#allocation4] sm:$0xff] }
 0xff4   :  { %1028 = vrot.lane.b32.xlu1 %v1021_v48, %s2880_s2 }
0x1063   :  { %v901_v49 = vpop.permute.xlu0 %900 }
0x1064   :  { %v903_v50 = vmul.f32 %v901_v49, %v881_v35 }
0x1066   :  { %920 = vrot.lane.b32.xlu0 %v903_v50, %s2882_s3  ;;  %v1029_v27 = vpop.permute.xlu1 %1028 }
0x10d8   :  { %v921_v51 = vpop.permute.xlu0 %920 }
0x10d9   :  { %923 = vst.msk [vmem:[#allocation3] sm:$0xff] %vm450_vm4, %v921_v51 }
0x10e0   :  { %v924_v52 = vld [vmem:[#allocation3] sm:$0xff] }
0x10e1   :  { %v925_v53 = vpack.c.bf16 %v924_v52, %v924_v52 }
0x10e3   :  { %2430 = vmatmul.mubr.msk.bf16.vlgmr.msra.gmra.mrb[8].mxu1 %vm81_vm0, %v925_v53 }
0x10e4   :  { %2601 = vmatprep.mubr.msk.bf16.mxu1 %vm2881_vm3, %v2878_v0 }
0x11b6   :  { %v1011_v54 = vpop.f32.mrb[8].mxu1 }
0x11b7   :  { %v1020_v55 = vadd.f32 %v1011_v54, %v3055_v30  ;;  %v1013_v56 = vpop.f32.mrb[9].mxu1 }
0x11b8   :  { %v1015_v57 = vpop.f32.mrb[10].mxu1  ;;  %v1048_v10 = vadd.f32 %v3083_v5, %v1013_v56 }
0x11b9   :  { %2740 = vtanh.f32 %v1020_v55  ;;  %v1016_v58 = vpop.f32.mrb[11].mxu1  ;;  %v1022_v60 = vmul.f32 0.5, %v1020_v55 }
0x11bb   :  { %2742 = vtanh.f32 %v1022_v60 }
0x11c3   :  { %v2741_v59 = vpop.eup %2740 }
0x11c4   :  { %1033 = vrot.lane.b32.xlu0 %v2741_v59, %s2880_s2 }
0x11c5   :  { %v2743_v61 = vpop.eup %2742 }
0x11c6   :  { %v1024_v32 = vmul.f32 0.5, %v2743_v61 }
0x11c8   :  { %v1025_v62 = vadd.f32 0.5, %v1024_v32 }
0x11ca   :  { %v1031_v3 = vmul.f32 %v1029_v27, %v1025_v62 }
0x1236   :  { %v1034_v63 = vpop.permute.xlu0 %1033 }
0x1237   :  { %v1036_v2 = vmul.f32 %v1034_v63, %v1025_v62  ;;  %v2662_v63 = vld [vmem:[#allocation8] sm:$0xff]  }
0x1238   :  { %2598 = vmatpush3.bf16.msra.mxu1 %v2662_v63  ;;  %v2676_v63 = vld [vmem:[#allocation8] sm:$0xff]  }
0x1239   :  { %1038 = vrot.lane.b32.xlu0 %v1036_v2, %s2880_s2  ;;  %v2663_v2 = vld [vmem:[#allocation8 + $0x8] sm:$0xff]   ;;  %2599 = vmatprep.subr.bf16.mxu1 %v2878_v0 }
0x123c   :  { %2600 = vmatpush3.bf16.msra.mxu1 %v2663_v2  ;;  %v2677_v2 = vld [vmem:[#allocation8 + $0x8] sm:$0xff]  }
0x12ab   :  { %v1039_v4 = vpop.permute.xlu0 %1038 }
0x12ac   :  { %v1041_v30 = vadd.f32 %v1039_v4, %v1031_v3 }
0x12ae   :  { %2744 = vtanh.f32 %v1041_v30 }
0x12b8   :  { %v2745_v6 = vpop.eup %2744 }
0x12b9   :  { %1044 = vrot.lane.b32.xlu1 %v2745_v6, %s2880_s2 }
0x12bd   :  { %910 = vrot.lane.b32.xlu1 %v897_v44, %s2882_s3 }
0x132b   :  { %v1045_v12 = vpop.permute.xlu1 %1044 }
0x132c   :  { %v1047_v13 = vmul.f32 %v1045_v12, %v1025_v62 }
0x132e   :  { %v1049_v15 = vpack.c.bf16 %v1047_v13, %v1047_v13 }
0x132f   :  { %v911_v16 = vpop.permute.xlu1 %910 }
0x1330   :  { %913 = vst.msk [vmem:[#allocation5] sm:$0xff] %vm83_vm2, %v911_v16  ;;  %1055 = vrot.lane.b32.xlu0 %v1049_v15, %s2872_s23 }
0x1337   :  { %v1113_v17 = vld [vmem:[#allocation5] sm:$0xff] }
0x1338   :  { %1120 = vrot.lane.b32.xlu1 %v1113_v17, %s2880_s2 }
0x13a2   :  { %v1056_v20 = vpop.permute.xlu0 %1055 }
0x13a3   :  { %2594 = vmatmul.mubr.msk.bf16.vlgmr.msra.gmra.mrb[24].mxu0 %vm83_vm2, %v1056_v20 }
0x13a4   :  { %1214 = vmatpush1.bf16.msra.mxu0 %v2994_v9  ;;  %1245 = vmatprep.mubr.bf16.mxu0 %v2879_v1 }
0x13a5   :  { %1215 = vmatprep.subr.bf16.mxu0 %v2999_v11 }
0x13a8   :  { %1216 = vmatpush1.bf16.msra.mxu0 %v3010_v14 }
0x13a9   :  { %1217 = vmatprep.subr.bf16.mxu0 %v3023_v18 }
0x13aa   :  { %v1121_v29 = vpop.permute.xlu1 %1120 }
0x13ac   :  { %1218 = vmatpush1.bf16.msra.mxu0 %v3025_v19 }
0x13ad   :  { %1219 = vmatprep.subr.bf16.mxu0 %v3027_v21 }
0x13b0   :  { %1220 = vmatpush1.bf16.msra.mxu0 %v3033_v22 }
0x13b1   :  { %2605 = vmatprep.subr.bf16.mxu0 %v2878_v0 }
0x1476   :  { %v1106_v23 = vpop.f32.mrb[24].mxu0 }
0x1477   :  { %v1112_v9 = vadd.f32 %v1106_v23, %v1048_v10  ;;  %v2595_v24 = vpop.f32.mrb[25].mxu0 }
0x1478   :  { %v1109_v25 = vpop.f32.mrb[26].mxu0 }
0x1479   :  { %2746 = vtanh.f32 %v1112_v9  ;;  %v2596_v11 = vpop.f32.mrb[27].mxu0  ;;  %v1114_v14 = vmul.f32 0.5, %v1112_v9 }
0x147b   :  { %2748 = vtanh.f32 %v1114_v14 }
0x1483   :  { %v2747_v26 = vpop.eup %2746 }
0x1484   :  { %1125 = vrot.lane.b32.xlu0 %v2747_v26, %s2880_s2 }
0x1485   :  { %v2749_v18 = vpop.eup %2748 }
0x1486   :  { %v1116_v19 = vmul.f32 0.5, %v2749_v18 }
0x1488   :  { %v1117_v21 = vadd.f32 0.5, %v1116_v19 }
0x148a   :  { %v1123_v31 = vmul.f32 %v1121_v29, %v1117_v21  ;;  %v3221_v29 = vld [vmem:[#allocation6 + $0x14] ss:$8 sps:$4 sm:$0xff]  }
0x14f6   :  { %v1126_v28 = vpop.permute.xlu0 %1125 }
0x14f7   :  { %v1128_v22 = vmul.f32 %v1126_v28, %v1117_v21  ;;  %v3219_v28 = vld [vmem:[#allocation6 + $0x4] ss:$8 sps:$4 sm:$0xff]  }
0x14f8   :  { %1449 = vmatprep.subr.bf16.mxu1 %v3219_v28 }
0x14f9   :  { %1130 = vrot.lane.b32.xlu0 %v1128_v22, %s2880_s2 }
0x14fd   :  { %1151 = vrot.lane.b32.xlu0 %v1047_v13, %s2872_s23 }
0x1501   :  { %1141 = vrot.lane.b32.xlu0 %v1041_v30, %s2882_s3 }
0x156b   :  { %v1131_v33 = vpop.permute.xlu0 %1130 }
0x156c   :  { %v1133_v35 = vadd.f32 %v1131_v33, %v1123_v31  ;;  %v3226_v31 = vld [vmem:[#allocation6 + $0x10] ss:$8 sps:$4 sm:$0xff]  }
0x156e   :  { %2750 = vtanh.f32 %v1133_v35 }
0x156f   :  { %v1152_v37 = vpop.permute.xlu0 %1151 }
0x1570   :  { %1154 = vst.msk [vmem:[#allocation3] sm:$0xff] %vm83_vm2, %v1152_v37 }
0x1573   :  { %v1142_v39 = vpop.permute.xlu0 %1141 }
0x1574   :  { %1144 = vst.msk [vmem:[#allocation4] sm:$0xff] %vm83_vm2, %v1142_v39  ;;  %v3233_v39 = vld [vmem:[#allocation6 + $0x20] ss:$8 sps:$4 sm:$0xff]  }
0x1578   :  { %v2751_v41 = vpop.eup %2750 }
0x1579   :  { %1136 = vrot.lane.b32.xlu1 %v2751_v41, %s2880_s2  ;;  %v3235_v41 = vld [vmem:[#allocation6 + $0x24] ss:$8 sps:$4 sm:$0xff]  }
0x157b   :  { %v1257_v42 = vld [vmem:[#allocation4] sm:$0xff] }
0x157c   :  { %1264 = vrot.lane.b32.xlu0 %v1257_v42, %s2880_s2  ;;  %v3237_v42 = vld [vmem:[#allocation6 + $0x34] ss:$8 sps:$4 sm:$0xff]  }
0x15eb   :  { %v1137_v43 = vpop.permute.xlu1 %1136 }
0x15ec   :  { %v1139_v44 = vmul.f32 %v1137_v43, %v1117_v21  ;;  %v3217_v21 = vld [vmem:[#allocation6] ss:$8 sps:$4 sm:$0xff]   ;;  %v3241_v43 = vld [vmem:[#allocation6 + $0x30] ss:$8 sps:$4 sm:$0xff]  }
0x15ee   :  { %1156 = vrot.lane.b32.xlu1 %v1139_v44, %s2882_s3  ;;  %v1265_v60 = vpop.permute.xlu0 %1264 }
0x1660   :  { %v1157_v45 = vpop.permute.xlu1 %1156 }
0x1661   :  { %1159 = vst.msk [vmem:[#allocation3] sm:$0xff] %vm450_vm4, %v1157_v45 }
0x1668   :  { %v1160_v46 = vld [vmem:[#allocation3] sm:$0xff] }
0x1669   :  { %v1161_v47 = vpack.c.bf16 %v1160_v46, %v1160_v46 }
0x166b   :  { %2442 = vmatmul.mubr.msk.bf16.vlgmr.msra.gmra.mrb[28].mxu0 %vm81_vm0, %v1161_v47 }
0x166c   :  { %2609 = vmatprep.mubr.msk.bf16.mxu0 %vm2881_vm3, %v2878_v0  ;;  %2606 = vmatpush3.bf16.msra.mxu0 %v2676_v63 }
0x166d   :  { %2607 = vmatprep.subr.bf16.mxu0 %v2878_v0 }
0x1670   :  { %2608 = vmatpush3.bf16.msra.mxu0 %v2677_v2 }
0x1671   :  { %1685 = vmatprep.subr.bf16.mxu0 %v3219_v28 }
0x173e   :  { %v1247_v48 = vpop.f32.mrb[28].mxu0 }
0x173f   :  { %v1256_v49 = vadd.f32 %v1247_v48, %v3061_v36  ;;  %v1249_v50 = vpop.f32.mrb[29].mxu0 }
0x1740   :  { %v1251_v51 = vpop.f32.mrb[30].mxu0  ;;  %v1284_v8 = vadd.f32 %v3083_v5, %v1249_v50 }
0x1741   :  { %2752 = vtanh.f32 %v1256_v49  ;;  %v1252_v52 = vpop.f32.mrb[31].mxu0  ;;  %v1258_v54 = vmul.f32 0.5, %v1256_v49 }
0x1743   :  { %2754 = vtanh.f32 %v1258_v54 }
0x174b   :  { %v2753_v53 = vpop.eup %2752 }
0x174c   :  { %1269 = vrot.lane.b32.xlu1 %v2753_v53, %s2880_s2 }
0x174d   :  { %v2755_v55 = vpop.eup %2754 }
0x174e   :  { %v1260_v56 = vmul.f32 0.5, %v2755_v55 }
0x1750   :  { %v1261_v57 = vadd.f32 0.5, %v1260_v56 }
0x1752   :  { %v1267_v61 = vmul.f32 %v1265_v60, %v1261_v57 }
0x17be   :  { %v1270_v58 = vpop.permute.xlu1 %1269 }
0x17bf   :  { %v1272_v59 = vmul.f32 %v1270_v58, %v1261_v57 }
0x17c1   :  { %1274 = vrot.lane.b32.xlu1 %v1272_v59, %s2880_s2 }
0x1833   :  { %v1275_v32 = vpop.permute.xlu1 %1274 }
0x1834   :  { %v1277_v36 = vadd.f32 %v1275_v32, %v1267_v61 }
0x1836   :  { %2756 = vtanh.f32 %v1277_v36 }
0x1840   :  { %v2757_v62 = vpop.eup %2756 }
0x1841   :  { %1280 = vrot.lane.b32.xlu0 %v2757_v62, %s2880_s2 }
0x1845   :  { %1146 = vrot.lane.b32.xlu0 %v1133_v35, %s2882_s3 }
0x18b3   :  { %v1281_v27 = vpop.permute.xlu0 %1280 }
0x18b4   :  { %v1283_v3 = vmul.f32 %v1281_v27, %v1261_v57 }
0x18b6   :  { %v1285_v4 = vpack.c.bf16 %v1283_v3, %v1283_v3 }
0x18b7   :  { %v1147_v30 = vpop.permute.xlu0 %1146 }
0x18b8   :  { %1149 = vst.msk [vmem:[#allocation5] sm:$0xff] %vm83_vm2, %v1147_v30  ;;  %1291 = vrot.lane.b32.xlu1 %v1285_v4, %s2872_s23 }
0x18bf   :  { %v1349_v6 = vld [vmem:[#allocation5] sm:$0xff] }
0x18c0   :  { %1356 = vrot.lane.b32.xlu0 %v1349_v6, %s2880_s2 }
0x192a   :  { %v1292_v7 = vpop.permute.xlu1 %1291 }
0x192b   :  { %2602 = vmatmul.mubr.msk.bf16.vlgmr.msra.gmra.mrb[12].mxu1 %vm83_vm2, %v1292_v7 }
0x192c   :  { %1481 = vmatprep.mubr.bf16.mxu1 %v2879_v1  ;;  %1450 = vmatpush1.bf16.msra.mxu1 %v3217_v21 }
0x192d   :  { %1451 = vmatprep.subr.bf16.mxu1 %v3221_v29 }
0x1930   :  { %1452 = vmatpush1.bf16.msra.mxu1 %v3226_v31 }
0x1931   :  { %1453 = vmatprep.subr.bf16.mxu1 %v3235_v41 }
0x1932   :  { %v1357_v26 = vpop.permute.xlu0 %1356 }
0x1934   :  { %1454 = vmatpush1.bf16.msra.mxu1 %v3233_v39 }
0x1935   :  { %1455 = vmatprep.subr.bf16.mxu1 %v3237_v42 }
0x1938   :  { %1456 = vmatpush1.bf16.msra.mxu1 %v3241_v43 }
0x1939   :  { %2613 = vmatprep.subr.bf16.mxu1 %v2878_v0 }
0x19fe   :  { %v1342_v12 = vpop.f32.mrb[12].mxu1 }
0x19ff   :  { %v1348_v13 = vadd.f32 %v1342_v12, %v1284_v8  ;;  %v2603_v15 = vpop.f32.mrb[13].mxu1 }
0x1a00   :  { %v1345_v16 = vpop.f32.mrb[14].mxu1 }
0x1a01   :  { %2758 = vtanh.f32 %v1348_v13  ;;  %v2604_v17 = vpop.f32.mrb[15].mxu1  ;;  %v1350_v10 = vmul.f32 0.5, %v1348_v13 }
0x1a03   :  { %2760 = vtanh.f32 %v1350_v10 }
0x1a0b   :  { %v2759_v20 = vpop.eup %2758 }
0x1a0c   :  { %1361 = vrot.lane.b32.xlu1 %v2759_v20, %s2880_s2 }
0x1a0d   :  { %v2761_v23 = vpop.eup %2760 }
0x1a0e   :  { %v1352_v9 = vmul.f32 0.5, %v2761_v23 }
0x1a10   :  { %v1353_v24 = vadd.f32 0.5, %v1352_v9 }
0x1a12   :  { %v1359_v14 = vmul.f32 %v1357_v26, %v1353_v24 }
0x1a7e   :  { %v1362_v25 = vpop.permute.xlu1 %1361 }
0x1a7f   :  { %v1364_v11 = vmul.f32 %v1362_v25, %v1353_v24 }
0x1a81   :  { %1366 = vrot.lane.b32.xlu1 %v1364_v11, %s2880_s2 }
0x1a85   :  { %1387 = vrot.lane.b32.xlu1 %v1283_v3, %s2872_s23 }
0x1a89   :  { %1377 = vrot.lane.b32.xlu1 %v1277_v36, %s2882_s3 }
0x1af3   :  { %v1367_v18 = vpop.permute.xlu1 %1366 }
0x1af4   :  { %v1369_v19 = vadd.f32 %v1367_v18, %v1359_v14 }
0x1af6   :  { %2762 = vtanh.f32 %v1369_v19 }
0x1af7   :  { %v1388_v22 = vpop.permute.xlu1 %1387 }
0x1af8   :  { %1390 = vst.msk [vmem:[#allocation3] sm:$0xff] %vm83_vm2, %v1388_v22 }
0x1afb   :  { %v1378_v33 = vpop.permute.xlu1 %1377 }
0x1afc   :  { %1380 = vst.msk [vmem:[#allocation4] sm:$0xff] %vm83_vm2, %v1378_v33 }
0x1b00   :  { %v2763_v35 = vpop.eup %2762 }
0x1b01   :  { %1372 = vrot.lane.b32.xlu0 %v2763_v35, %s2880_s2 }
0x1b03   :  { %v1493_v37 = vld [vmem:[#allocation4] sm:$0xff] }
0x1b04   :  { %1500 = vrot.lane.b32.xlu1 %v1493_v37, %s2880_s2 }
0x1b73   :  { %v1373_v44 = vpop.permute.xlu0 %1372 }
0x1b74   :  { %v1375_v45 = vmul.f32 %v1373_v44, %v1353_v24 }
0x1b76   :  { %1392 = vrot.lane.b32.xlu0 %v1375_v45, %s2882_s3  ;;  %v1501_v61 = vpop.permute.xlu1 %1500 }
0x1be8   :  { %v1393_v46 = vpop.permute.xlu0 %1392 }
0x1be9   :  { %1395 = vst.msk [vmem:[#allocation3] sm:$0xff] %vm450_vm4, %v1393_v46 }
0x1bf0   :  { %v1396_v47 = vld [vmem:[#allocation3] sm:$0xff] }
0x1bf1   :  { %v1397_v48 = vpack.c.bf16 %v1396_v47, %v1396_v47 }
0x1bf3   :  { %2454 = vmatmul.mubr.msk.bf16.vlgmr.msra.gmra.mrb[16].mxu1 %vm81_vm0, %v1397_v48 }
0x1bf4   :  { %2617 = vmatprep.mubr.msk.bf16.mxu1 %vm2881_vm3, %v2878_v0 }
0x1cc6   :  { %v1483_v49 = vpop.f32.mrb[16].mxu1 }
0x1cc7   :  { %v1492_v50 = vadd.f32 %v1483_v49, %v3065_v40  ;;  %v1485_v51 = vpop.f32.mrb[17].mxu1 }
0x1cc8   :  { %v1487_v52 = vpop.f32.mrb[18].mxu1  ;;  %v1520_v8 = vadd.f32 %v3083_v5, %v1485_v51 }
0x1cc9   :  { %2764 = vtanh.f32 %v1492_v50  ;;  %v1488_v53 = vpop.f32.mrb[19].mxu1  ;;  %v1494_v55 = vmul.f32 0.5, %v1492_v50 }
0x1ccb   :  { %2766 = vtanh.f32 %v1494_v55 }
0x1cd3   :  { %v2765_v54 = vpop.eup %2764 }
0x1cd4   :  { %1505 = vrot.lane.b32.xlu0 %v2765_v54, %s2880_s2 }
0x1cd5   :  { %v2767_v56 = vpop.eup %2766 }
0x1cd6   :  { %v1496_v57 = vmul.f32 0.5, %v2767_v56 }
0x1cd8   :  { %v1497_v58 = vadd.f32 0.5, %v1496_v57 }
0x1cda   :  { %v1503_v32 = vmul.f32 %v1501_v61, %v1497_v58 }
0x1d46   :  { %v1506_v59 = vpop.permute.xlu0 %1505 }
0x1d47   :  { %v1508_v60 = vmul.f32 %v1506_v59, %v1497_v58 }
0x1d49   :  { %1510 = vrot.lane.b32.xlu0 %v1508_v60, %s2880_s2 }
0x1dbb   :  { %v1511_v36 = vpop.permute.xlu0 %1510 }
0x1dbc   :  { %v1513_v40 = vadd.f32 %v1511_v36, %v1503_v32 }
0x1dbe   :  { %2768 = vtanh.f32 %v1513_v40 }
0x1dc8   :  { %v2769_v62 = vpop.eup %2768 }
0x1dc9   :  { %1516 = vrot.lane.b32.xlu1 %v2769_v62, %s2880_s2  ;;  %v2679_v62 = vld [vmem:[#allocation8 + $0x8] sm:$0xff]  }
0x1dcd   :  { %1382 = vrot.lane.b32.xlu1 %v1369_v19, %s2882_s3 }
0x1e3b   :  { %v1517_v27 = vpop.permute.xlu1 %1516 }
0x1e3c   :  { %v1519_v3 = vmul.f32 %v1517_v27, %v1497_v58 }
0x1e3e   :  { %v1521_v4 = vpack.c.bf16 %v1519_v3, %v1519_v3 }
0x1e3f   :  { %v1383_v30 = vpop.permute.xlu1 %1382 }
0x1e40   :  { %1385 = vst.msk [vmem:[#allocation5] sm:$0xff] %vm83_vm2, %v1383_v30  ;;  %1527 = vrot.lane.b32.xlu0 %v1521_v4, %s2872_s23 }
0x1e47   :  { %v1585_v6 = vld [vmem:[#allocation5] sm:$0xff] }
0x1e48   :  { %1592 = vrot.lane.b32.xlu1 %v1585_v6, %s2880_s2 }
0x1eb2   :  { %v1528_v7 = vpop.permute.xlu0 %1527 }
0x1eb3   :  { %2610 = vmatmul.mubr.msk.bf16.vlgmr.msra.gmra.mrb[32].mxu0 %vm83_vm2, %v1528_v7 }
0x1eb4   :  { %1686 = vmatpush1.bf16.msra.mxu0 %v3217_v21  ;;  %1717 = vmatprep.mubr.bf16.mxu0 %v2879_v1 }
0x1eb5   :  { %1687 = vmatprep.subr.bf16.mxu0 %v3221_v29 }
0x1eb8   :  { %1688 = vmatpush1.bf16.msra.mxu0 %v3226_v31 }
0x1eb9   :  { %1689 = vmatprep.subr.bf16.mxu0 %v3235_v41 }
0x1eba   :  { %v1593_v5 = vpop.permute.xlu1 %1592 }
0x1ebc   :  { %1690 = vmatpush1.bf16.msra.mxu0 %v3233_v39 }
0x1ebd   :  { %1691 = vmatprep.subr.bf16.mxu0 %v3237_v42 }
0x1ec0   :  { %1692 = vmatpush1.bf16.msra.mxu0 %v3241_v43 }
0x1ec1   :  { %2621 = vmatprep.subr.bf16.mxu0 %v2878_v0 }
0x1f86   :  { %v1578_v12 = vpop.f32.mrb[32].mxu0 }
0x1f87   :  { %v1584_v13 = vadd.f32 %v1578_v12, %v1520_v8  ;;  %v2611_v15 = vpop.f32.mrb[33].mxu0 }
0x1f88   :  { %v1581_v16 = vpop.f32.mrb[34].mxu0 }
0x1f89   :  { %2770 = vtanh.f32 %v1584_v13  ;;  %v2612_v17 = vpop.f32.mrb[35].mxu0  ;;  %v1586_v10 = vmul.f32 0.5, %v1584_v13 }
0x1f8b   :  { %2772 = vtanh.f32 %v1586_v10 }
0x1f93   :  { %v2771_v20 = vpop.eup %2770 }
0x1f94   :  { %1597 = vrot.lane.b32.xlu0 %v2771_v20, %s2880_s2 }
0x1f95   :  { %v2773_v23 = vpop.eup %2772 }
0x1f96   :  { %v1588_v9 = vmul.f32 0.5, %v2773_v23 }
0x1f98   :  { %v1589_v24 = vadd.f32 0.5, %v1588_v9 }
0x1f9a   :  { %v1595_v26 = vmul.f32 %v1593_v5, %v1589_v24 }
0x2006   :  { %v1598_v25 = vpop.permute.xlu0 %1597 }
0x2007   :  { %v1600_v11 = vmul.f32 %v1598_v25, %v1589_v24 }
0x2009   :  { %1602 = vrot.lane.b32.xlu0 %v1600_v11, %s2880_s2 }
0x200d   :  { %1623 = vrot.lane.b32.xlu0 %v1519_v3, %s2872_s23 }
0x2011   :  { %1613 = vrot.lane.b32.xlu0 %v1513_v40, %s2882_s3  ;;  %v2678_v40 = vld [vmem:[#allocation8] sm:$0xff]  }
0x2012   :  { %2614 = vmatpush3.bf16.msra.mxu1 %v2678_v40 }
0x2013   :  { %2615 = vmatprep.subr.bf16.mxu1 %v2878_v0 }
0x2016   :  { %2616 = vmatpush3.bf16.msra.mxu1 %v2679_v62 }
0x2017   :  { %1921 = vmatprep.subr.bf16.mxu1 %v3219_v28  ;;  %v3307_v28 = vld [vmem:[%s3408_s5] ss:$0 sm:$0xff] }
0x207b   :  { %v1603_v14 = vpop.permute.xlu0 %1602 }
0x207c   :  { %v1605_v18 = vadd.f32 %v1603_v14, %v1595_v26 }
0x207e   :  { %2774 = vtanh.f32 %v1605_v18 }
0x207f   :  { %v1624_v19 = vpop.permute.xlu0 %1623 }
0x2080   :  { %1626 = vst.msk [vmem:[#allocation3] sm:$0xff] %vm83_vm2, %v1624_v19 }
0x2083   :  { %v1614_v22 = vpop.permute.xlu0 %1613 }
0x2084   :  { %1616 = vst.msk [vmem:[#allocation4] sm:$0xff] %vm83_vm2, %v1614_v22 }
0x2088   :  { %v2775_v33 = vpop.eup %2774 }
0x2089   :  { %1608 = vrot.lane.b32.xlu1 %v2775_v33, %s2880_s2 }
0x208b   :  { %v1729_v35 = vld [vmem:[#allocation4] sm:$0xff] }
0x208c   :  { %1736 = vrot.lane.b32.xlu0 %v1729_v35, %s2880_s2 }
0x20fb   :  { %v1609_v37 = vpop.permute.xlu1 %1608 }
0x20fc   :  { %v1611_v44 = vmul.f32 %v1609_v37, %v1589_v24 }
0x20fe   :  { %1628 = vrot.lane.b32.xlu1 %v1611_v44, %s2882_s3  ;;  %v1737_v60 = vpop.permute.xlu0 %1736 }
0x2170   :  { %v1629_v45 = vpop.permute.xlu1 %1628 }
0x2171   :  { %1631 = vst.msk [vmem:[#allocation3] sm:$0xff] %vm450_vm4, %v1629_v45 }
0x2178   :  { %v1632_v46 = vld [vmem:[#allocation3] sm:$0xff] }
0x2179   :  { %v1633_v47 = vpack.c.bf16 %v1632_v46, %v1632_v46 }
0x217b   :  { %2466 = vmatmul.mubr.msk.bf16.vlgmr.msra.gmra.mrb[36].mxu0 %vm81_vm0, %v1633_v47 }
0x217c   :  { %2625 = vmatprep.mubr.msk.bf16.mxu0 %vm2881_vm3, %v2878_v0 }
0x224e   :  { %v1719_v48 = vpop.f32.mrb[36].mxu0 }
0x224f   :  { %v1728_v49 = vadd.f32 %v1719_v48, %v3059_v34  ;;  %v1721_v50 = vpop.f32.mrb[37].mxu0 }
0x2250   :  { %v1723_v51 = vpop.f32.mrb[38].mxu0 }
0x2251   :  { %2776 = vtanh.f32 %v1728_v49  ;;  %v1724_v52 = vpop.f32.mrb[39].mxu0  ;;  %v1730_v54 = vmul.f32 0.5, %v1728_v49 }
0x2253   :  { %2778 = vtanh.f32 %v1730_v54 }
0x225b   :  { %v2777_v53 = vpop.eup %2776 }
0x225c   :  { %1741 = vrot.lane.b32.xlu1 %v2777_v53, %s2880_s2 }
0x225d   :  { %v2779_v55 = vpop.eup %2778 }
0x225e   :  { %v1732_v56 = vmul.f32 0.5, %v2779_v55  ;;  %v2680_v55 = vld [vmem:[#allocation8] sm:$0xff]  }
0x225f   :  { %2622 = vmatpush3.bf16.msra.mxu0 %v2680_v55 }
0x2260   :  { %v1733_v57 = vadd.f32 0.5, %v1732_v56  ;;  %v2681_v56 = vld [vmem:[#allocation8 + $0x8] sm:$0xff]   ;;  %2623 = vmatprep.subr.bf16.mxu0 %v2878_v0 }
0x2262   :  { %v1739_v61 = vmul.f32 %v1737_v60, %v1733_v57 }
0x2263   :  { %2624 = vmatpush3.bf16.msra.mxu0 %v2681_v56 }
0x22ce   :  { %v1742_v58 = vpop.permute.xlu1 %1741 }
0x22cf   :  { %v1744_v59 = vmul.f32 %v1742_v58, %v1733_v57 }
0x22d1   :  { %1746 = vrot.lane.b32.xlu1 %v1744_v59, %s2880_s2 }
0x2343   :  { %v1747_v32 = vpop.permute.xlu1 %1746 }
0x2344   :  { %v1749_v34 = vadd.f32 %v1747_v32, %v1739_v61 }
0x2346   :  { %2780 = vtanh.f32 %v1749_v34 }
0x2350   :  { %v2781_v36 = vpop.eup %2780 }
0x2351   :  { %1752 = vrot.lane.b32.xlu0 %v2781_v36, %s2880_s2 }
0x2355   :  { %1618 = vrot.lane.b32.xlu0 %v1605_v18, %s2882_s3 }
0x23c3   :  { %v1753_v63 = vpop.permute.xlu0 %1752 }
0x23c4   :  { %v1755_v2 = vmul.f32 %v1753_v63, %v1733_v57 }
0x23c6   :  { %v1757_v27 = vpack.c.bf16 %v1755_v2, %v1755_v2 }
0x23c7   :  { %v1619_v3 = vpop.permute.xlu0 %1618 }
0x23c8   :  { %1621 = vst.msk [vmem:[#allocation5] sm:$0xff] %vm83_vm2, %v1619_v3  ;;  %1763 = vrot.lane.b32.xlu1 %v1757_v27, %s2872_s23 }
0x23cf   :  { %v1821_v4 = vld [vmem:[#allocation5] sm:$0xff] }
0x23d0   :  { %1828 = vrot.lane.b32.xlu0 %v1821_v4, %s2880_s2 }
0x243a   :  { %v1764_v30 = vpop.permute.xlu1 %1763 }
0x243b   :  { %2618 = vmatmul.mubr.msk.bf16.vlgmr.msra.gmra.mrb[20].mxu1 %vm83_vm2, %v1764_v30 }
0x243c   :  { %1922 = vmatpush1.bf16.msra.mxu1 %v3217_v21  ;;  %1953 = vmatprep.mubr.bf16.mxu1 %v2879_v1  ;;  %v1756_v21 = vadd.f32 %v3307_v28, %v1721_v50 }
0x243d   :  { %1923 = vmatprep.subr.bf16.mxu1 %v3221_v29 }
0x2440   :  { %1924 = vmatpush1.bf16.msra.mxu1 %v3226_v31 }
0x2441   :  { %1925 = vmatprep.subr.bf16.mxu1 %v3235_v41 }
0x2442   :  { %v1829_v16 = vpop.permute.xlu0 %1828 }
0x2444   :  { %1926 = vmatpush1.bf16.msra.mxu1 %v3233_v39 }
0x2445   :  { %1927 = vmatprep.subr.bf16.mxu1 %v3237_v42 }
0x2448   :  { %1928 = vmatpush1.bf16.msra.mxu1 %v3241_v43 }
0x250e   :  { %v1814_v6 = vpop.f32.mrb[20].mxu1 }
0x250f   :  { %v1820_v7 = vadd.f32 %v1814_v6, %v1756_v21  ;;  %v2619_v29 = vpop.f32.mrb[21].mxu1 }
0x2510   :  { %v1817_v8 = vpop.f32.mrb[22].mxu1 }
0x2511   :  { %2782 = vtanh.f32 %v1820_v7  ;;  %v2620_v31 = vpop.f32.mrb[23].mxu1  ;;  %v1822_v39 = vmul.f32 0.5, %v1820_v7 }
0x2513   :  { %2784 = vtanh.f32 %v1822_v39 }
0x251b   :  { %v2783_v41 = vpop.eup %2782 }
0x251c   :  { %1833 = vrot.lane.b32.xlu1 %v2783_v41, %s2880_s2 }
0x251d   :  { %v2785_v42 = vpop.eup %2784 }
0x251e   :  { %v1824_v43 = vmul.f32 0.5, %v2785_v42  ;;  %v2682_v42 = vld [vmem:[#allocation10] ss:$8 sps:$4 sm:$0xff]  }
0x2520   :  { %v1825_v12 = vadd.f32 0.5, %v1824_v43  ;;  %v2684_v43 = vld [vmem:[#allocation10 + $0x4] ss:$8 sps:$4 sm:$0xff]  }
0x2521   :  { %2151 = vmatprep.subr.bf16.mxu0 %v2684_v43 }
0x2522   :  { %v1831_v17 = vmul.f32 %v1829_v16, %v1825_v12  ;;  %v2688_v16 = vld [vmem:[%s3411_s8 + $0x40] sm:$0xff]  }
0x2523   :  { %2533 = vmatprep.subr.bf16.mxu1 %v2688_v16 }
0x258e   :  { %v1834_v13 = vpop.permute.xlu1 %1833 }
0x258f   :  { %v1836_v15 = vmul.f32 %v1834_v13, %v1825_v12  ;;  %v2685_v13 = vld [vmem:[#allocation10 + $0x10] ss:$8 sps:$4 sm:$0xff]  }
0x2591   :  { %1838 = vrot.lane.b32.xlu1 %v1836_v15, %s2880_s2 }
0x2595   :  { %1859 = vrot.lane.b32.xlu1 %v1755_v2, %s2872_s23 }
0x2599   :  { %1849 = vrot.lane.b32.xlu1 %v1749_v34, %s2882_s3 }
0x2603   :  { %v1839_v20 = vpop.permute.xlu1 %1838 }
0x2604   :  { %v1841_v10 = vadd.f32 %v1839_v20, %v1831_v17  ;;  %v2689_v17 = vld [vmem:[%s3411_s8] sm:$0xff]   ;;  %v2690_v20 = vld [vmem:[%s3411_s8 + $0x48] sm:$0xff]  }
0x2606   :  { %2786 = vtanh.f32 %v1841_v10 }
0x2607   :  { %v1860_v23 = vpop.permute.xlu1 %1859 }
0x2608   :  { %1862 = vst.msk [vmem:[#allocation3] sm:$0xff] %vm83_vm2, %v1860_v23  ;;  %v2691_v23 = vld [vmem:[%s3411_s8 + $0x8] sm:$0xff]  }
0x260b   :  { %v1850_v9 = vpop.permute.xlu1 %1849 }
0x260c   :  { %1852 = vst.msk [vmem:[#allocation4] sm:$0xff] %vm83_vm2, %v1850_v9  ;;  %v2692_v9 = vld [vmem:[%s3411_s8 + $0x50] sm:$0xff]  }
0x2610   :  { %v2787_v24 = vpop.eup %2786 }
0x2611   :  { %1844 = vrot.lane.b32.xlu0 %v2787_v24, %s2880_s2 }
0x2613   :  { %v1965_v25 = vld [vmem:[#allocation4] sm:$0xff] }
0x2614   :  { %1972 = vrot.lane.b32.xlu1 %v1965_v25, %s2880_s2 }
0x2683   :  { %v1845_v11 = vpop.permute.xlu0 %1844 }
0x2684   :  { %v1847_v5 = vmul.f32 %v1845_v11, %v1825_v12  ;;  %v2687_v12 = vld [vmem:[#allocation10 + $0x14] ss:$8 sps:$4 sm:$0xff]   ;;  %v2693_v11 = vld [vmem:[%s3411_s8 + $0x10] sm:$0xff]  }
0x2686   :  { %1864 = vrot.lane.b32.xlu0 %v1847_v5, %s2882_s3  ;;  %v1973_v51 = vpop.permute.xlu1 %1972  ;;  %v2694_v5 = vld [vmem:[%s3411_s8 + $0x58] sm:$0xff]  }
0x26f8   :  { %v1865_v26 = vpop.permute.xlu0 %1864 }
0x26f9   :  { %1867 = vst.msk [vmem:[#allocation3] sm:$0xff] %vm450_vm4, %v1865_v26  ;;  %v2695_v26 = vld [vmem:[%s3411_s8 + $0x18] sm:$0xff]  }
0x2700   :  { %v1868_v14 = vld [vmem:[#allocation3] sm:$0xff] }
0x2701   :  { %v1869_v18 = vpack.c.bf16 %v1868_v14, %v1868_v14  ;;  %v2696_v14 = vld [vmem:[%s3411_s8 + $0x60] sm:$0xff]  }
0x2703   :  { %2478 = vmatmul.mubr.msk.bf16.vlgmr.msra.gmra.mrb[24].mxu1 %vm81_vm0, %v1869_v18  ;;  %v2697_v18 = vld [vmem:[%s3411_s8 + $0x20] sm:$0xff]  }
0x2704   :  { %2534 = vmatpush3.bf16.msra.mxu1 %v2689_v17 }
0x2705   :  { %2535 = vmatprep.subr.bf16.mxu1 %v2690_v20 }
0x2708   :  { %2536 = vmatpush3.bf16.msra.mxu1 %v2691_v23 }
0x2709   :  { %2537 = vmatprep.subr.bf16.mxu1 %v2692_v9 }
0x270c   :  { %2538 = vmatpush3.bf16.msra.mxu1 %v2693_v11 }
0x270d   :  { %2539 = vmatprep.subr.bf16.mxu1 %v2694_v5 }
0x2710   :  { %2540 = vmatpush3.bf16.msra.mxu1 %v2695_v26 }
0x2711   :  { %2541 = vmatprep.subr.bf16.mxu1 %v2696_v14 }
0x2714   :  { %2542 = vmatpush3.bf16.msra.mxu1 %v2697_v18 }
0x27d6   :  { %v1955_v19 = vpop.f32.mrb[24].mxu1 }
0x27d7   :  { %v1964_v22 = vadd.f32 %v1955_v19, %v3063_v38  ;;  %v1957_v33 = vpop.f32.mrb[25].mxu1  ;;  %v2698_v19 = vld [vmem:[%s3411_s8 + $0x68] sm:$0xff]  }
0x27d8   :  { %v1959_v35 = vpop.f32.mrb[26].mxu1  ;;  %v1992_v0 = vadd.f32 %v3307_v28, %v1957_v33  ;;  %2543 = vmatprep.subr.bf16.mxu1 %v2698_v19 }
0x27d9   :  { %2788 = vtanh.f32 %v1964_v22  ;;  %v1960_v37 = vpop.f32.mrb[27].mxu1  ;;  %v1966_v45 = vmul.f32 0.5, %v1964_v22  ;;  %v2699_v22 = vld [vmem:[%s3411_s8 + $0x28] sm:$0xff]  }
0x27da   :  { %2544 = vmatpush3.bf16.msra.mxu1 %v2699_v22  ;;  %v2700_v37 = vld [vmem:[%s3411_s8 + $0x70] sm:$0xff]  }
0x27db   :  { %2790 = vtanh.f32 %v1966_v45  ;;  %2545 = vmatprep.subr.bf16.mxu1 %v2700_v37  ;;  %v2702_v45 = vld [vmem:[%s3411_s8 + $0x78] sm:$0xff]  }
0x27e3   :  { %v2789_v44 = vpop.eup %2788 }
0x27e4   :  { %1977 = vrot.lane.b32.xlu0 %v2789_v44, %s2880_s2  ;;  %v2701_v44 = vld [vmem:[%s3411_s8 + $0x30] sm:$0xff]  }
0x27e5   :  { %v2791_v46 = vpop.eup %2790  ;;  %2546 = vmatpush3.bf16.msra.mxu1 %v2701_v44 }
0x27e6   :  { %v1968_v47 = vmul.f32 0.5, %v2791_v46  ;;  %v2703_v46 = vld [vmem:[%s3411_s8 + $0x38] sm:$0xff]   ;;  %2547 = vmatprep.subr.bf16.mxu1 %v2702_v45 }
0x27e8   :  { %v1969_v48 = vadd.f32 0.5, %v1968_v47  ;;  %v2115_v47 = vlaneseq }
0x27e9   :  { %2548 = vmatpush3.bf16.msra.mxu1 %v2703_v46 }
0x27ea   :  { %v1975_v52 = vmul.f32 %v1973_v51, %v1969_v48 }
0x2856   :  { %v1978_v49 = vpop.permute.xlu0 %1977 }
0x2857   :  { %v1980_v50 = vmul.f32 %v1978_v49, %v1969_v48 }
0x2859   :  { %1982 = vrot.lane.b32.xlu0 %v1980_v50, %s2880_s2  ;;  %v2113_v50 = vld [vmem:[%s3410_s7] sm:$0x3] }
0x28cb   :  { %v1983_v53 = vpop.permute.xlu0 %1982 }
0x28cc   :  { %v1985_v38 = vadd.f32 %v1983_v53, %v1975_v52 }
0x28ce   :  { %2792 = vtanh.f32 %v1985_v38 }
0x28d8   :  { %v2793_v54 = vpop.eup %2792 }
0x28d9   :  { %1988 = vrot.lane.b32.xlu1 %v2793_v54, %s2880_s2 }
0x28dd   :  { %1854 = vrot.lane.b32.xlu1 %v1841_v10, %s2882_s3 }
0x294b   :  { %v1989_v57 = vpop.permute.xlu1 %1988 }
0x294c   :  { %v1991_v58 = vmul.f32 %v1989_v57, %v1969_v48  ;;  %v2116_v48 = vshrl.u32 %v2115_v47, 7 }
0x294e   :  { %v1993_v59 = vpack.c.bf16 %v1991_v58, %v1991_v58  ;;  %v2117_v49 = vsub.s32 0, %v2116_v48  ;;  %v2121_v51 = vsub.s32 1, %v2116_v48 }
0x294f   :  { %v1855_v60 = vpop.permute.xlu1 %1854 }
0x2950   :  { %1857 = vst.msk [vmem:[#allocation5] sm:$0xff] %vm83_vm2, %v1855_v60  ;;  %1999 = vrot.lane.b32.xlu0 %v1993_v59, %s2872_s23  ;;  %v2118_v52 = vrot.slane %v2113_v50, %v2117_v49  ;;  %v2122_v53 = vrot.slane %v2113_v50, %v2121_v51 }
0x2957   :  { %v2057_v61 = vld [vmem:[#allocation5] sm:$0xff] }
0x2958   :  { %2064 = vrot.lane.b32.xlu1 %v2057_v61, %s2880_s2 }
0x29c2   :  { %v2000_v32 = vpop.permute.xlu0 %1999 }
0x29c3   :  { %2626 = vmatmul.mubr.msk.bf16.vlgmr.msra.gmra.mrb[40].mxu0 %vm83_vm2, %v2000_v32 }
0x29c4   :  { %2183 = vmatprep.mubr.bf16.mxu0 %v2879_v1  ;;  %2152 = vmatpush1.bf16.msra.mxu0 %v2682_v42 }
0x29c5   :  { %2153 = vmatprep.subr.bf16.mxu0 %v2687_v12 }
0x29c8   :  { %2154 = vmatpush1.bf16.msra.mxu0 %v2685_v13 }
0x29ca   :  { %v2065_v1 = vpop.permute.xlu1 %2064 }
0x2a96   :  { %v2050_v34 = vpop.f32.mrb[40].mxu0 }
0x2a97   :  { %v2056_v36 = vadd.f32 %v2050_v34, %v1992_v0  ;;  %v2627_v40 = vpop.f32.mrb[41].mxu0  ;;  %v2487_v34 = vld [vmem:[%s3412_s9] ss:$0 sm:$0xff] }
0x2a98   :  { %v2053_v62 = vpop.f32.mrb[42].mxu0 }
0x2a99   :  { %2794 = vtanh.f32 %v2056_v36  ;;  %v2628_v63 = vpop.f32.mrb[43].mxu0  ;;  %v2058_v27 = vmul.f32 0.5, %v2056_v36 }
0x2a9b   :  { %2796 = vtanh.f32 %v2058_v27 }
0x2aa3   :  { %v2795_v2 = vpop.eup %2794 }
0x2aa4   :  { %2069 = vrot.lane.b32.xlu0 %v2795_v2, %s2880_s2 }
0x2aa5   :  { %v2797_v3 = vpop.eup %2796 }
0x2aa6   :  { %v2060_v4 = vmul.f32 0.5, %v2797_v3 }
0x2aa8   :  { %v2061_v30 = vadd.f32 0.5, %v2060_v4 }
0x2aaa   :  { %v2067_v28 = vmul.f32 %v2065_v1, %v2061_v30 }
0x2b16   :  { %v2070_v21 = vpop.permute.xlu0 %2069 }
0x2b17   :  { %v2072_v6 = vmul.f32 %v2070_v21, %v2061_v30 }
0x2b19   :  { %2074 = vrot.lane.b32.xlu0 %v2072_v6, %s2880_s2 }
0x2b1d   :  { %2095 = vrot.lane.b32.xlu0 %v1991_v58, %s2872_s23 }
0x2b8b   :  { %v2075_v7 = vpop.permute.xlu0 %2074 }
0x2b8c   :  { %v2077_v29 = vadd.f32 %v2075_v7, %v2067_v28 }
0x2b8e   :  { %2798 = vtanh.f32 %v2077_v29 }
0x2b8f   :  { %v2096_v8 = vpop.permute.xlu0 %2095 }
0x2b90   :  { %2098 = vst.msk [vmem:[#allocation3] sm:$0xff] %vm83_vm2, %v2096_v8 }
0x2b98   :  { %v2799_v31 = vpop.eup %2798 }
0x2b99   :  { %2080 = vrot.lane.b32.xlu1 %v2799_v31, %s2880_s2 }
0x2c0b   :  { %v2081_v41 = vpop.permute.xlu1 %2080 }
0x2c0c   :  { %v2083_v39 = vmul.f32 %v2081_v41, %v2061_v30 }
0x2c0e   :  { %2100 = vrot.lane.b32.xlu1 %v2083_v39, %s2882_s3 }
0x2c12   :  { %2085 = vrot.lane.b32.xlu1 %v1985_v38, %s2882_s3 }
0x2c80   :  { %v2101_v15 = vpop.permute.xlu1 %2100 }
0x2c81   :  { %2103 = vst.msk [vmem:[#allocation3] sm:$0xff] %vm450_vm4, %v2101_v15 }
0x2c84   :  { %v2086_v10 = vpop.permute.xlu1 %2085 }
0x2c85   :  { %2088 = vst.msk [vmem:[#allocation4] sm:$0xff] %vm83_vm2, %v2086_v10 }
0x2c88   :  { %v2107_v24 = vld [vmem:[#allocation3] sm:$0xff] }
0x2c89   :  { %v2108_v25 = vpack.c.bf16 %v2107_v24, %v2107_v24 }
0x2c8b   :  { %2126 = vrot.lane.b32.xlu0 %v2108_v25, %s2882_s3 }
0x2c8f   :  { %2090 = vrot.lane.b32.xlu0 %v2077_v29, %s2882_s3 }
0x2cfd   :  { %v2127_v33 = vpop.permute.xlu0 %2126 }
0x2cfe   :  { %2486 = vmatmul.mubr.msk.bf16.vlgmr.msra.gmra.mrb[44].mxu0 %vm83_vm2, %v2127_v33 }
0x2d01   :  { %v2091_v35 = vpop.permute.xlu0 %2090 }
0x2d02   :  { %2093 = vst.msk [vmem:[#allocation5] sm:$0xff] %vm83_vm2, %v2091_v35 }
0x2dd1   :  { %v2185_v38 = vpop.f32.mrb[44].mxu0 }
0x2dd2   :  { %v2186_v54 = vadd.f32 %v2185_v38, %v2118_v52  ;;  %v2187_v55 = vpop.f32.mrb[45].mxu0 }
0x2dd3   :  { %v2188_v56 = vadd.f32 %v2187_v55, %v2122_v53  ;;  %v2189_v57 = vpop.f32.mrb[46].mxu0 }
0x2dd4   :  { %v2192_v58 = vmax.f32 %v2186_v54, 0.0  ;;  %v2190_v59 = vpop.f32.mrb[47].mxu0 }
0x2dd5   :  { %v2193_v60 = vmax.f32 %v2188_v56, 0.0 }
0x2dd6   :  { %v2194_v32 = vpack.c.bf16 %v2192_v58, %v2192_v58 }
0x2dd7   :  { %v2195_v61 = vpack.c.bf16 %v2193_v60, %v2193_v60 }
0x2dd9   :  { %2363 = vmatprep.mubr.bf16.mxu1 %v2195_v61 }
0x2dda   :  { %2364 = vmatmul.mubr.bf16.vlgmr.msra.gmra.mrb[28].mxu1 %v2194_v32 }
0x2ead   :  { %v2549_v0 = vpop.f32.mrb[28].mxu1 }
0x2eae   :  { %v2550_v36 = vpop.f32.mrb[29].mxu1 }
0x2eaf   :  { %v2551_v40 = vadd.f32 %v2550_v36, %v2549_v0  ;;  %v2552_v62 = vpop.f32.mrb[30].mxu1 }
0x2eb0   :  { %v2553_v63 = vpop.f32.mrb[31].mxu1 }
0x2eb1   :  { %v2366_v2 = vadd.f32 %v2551_v40, %v2487_v34 }
0x2eb3   :  { %v2371_v27 = vmax.f32 %v2366_v2, 0.0 }
0x2eb5   :  { %2372 = vst [vmem:[%s3413_s10] sm:$0xff] %v2371_v27 }
0x2eb6   :  { %2377 = vsyncpa [#allocation7], 1 }
0x2eb7   :  { %2378 = vsyncpa [#allocation9], 1 }

</bundles_post_ra>
